<compile_context>
chip_gen: v7x
topology: tpu7x:2x2x1
jax: 0.10.0
libtpu: 0.0.40
codegen_flags: <defaults>
</compile_context>

<pallas_src>
import jax
import jax.numpy as jnp
from jax.experimental import pallas as pl
from jax.experimental.pallas import tpu as pltpu


def _round_up(x, m):
    return ((x + m - 1) // m) * m


def _pick_tile(n, candidates):
    for t in candidates:
        if t <= n and n % t == 0:
            return t
    return n


def _default_vmem_limit():
    # Defaults are 16/32 MiB scoped vs 128/128/64 MiB physical; size the limit
    # per generation, always leaving headroom.
    try:
        cap = pltpu.get_tpu_info().vmem_capacity_bytes
    except Exception:
        cap = 64 * 1024 * 1024                      # conservative (v7x physical)
    return int(min(cap * 0.8, 100 * 1024 * 1024))


_VMEM_LIMIT = _default_vmem_limit()


# ----------------------------------------------------------------------------
# Kernel 1: generic tiled linear  y = x @ w + b   (bf16 inputs, f32 out).
# Used for the vocab projection.  Rows AND columns are tiled; tile sizes are
# capped by a VMEM byte budget, lane-dense unmasked stores.
# ----------------------------------------------------------------------------
def _linear_kernel(x_ref, w_ref, b_ref, o_ref):
    o_ref[...] = (jnp.dot(x_ref[...], w_ref[...],
                          preferred_element_type=jnp.float32)
                  + b_ref[...])


def linear(x, w, b):
    """x: (N, K) bf16, w: (K, M) bf16, b: (1, M) f32 -> (N, M) f32.

    N must be a multiple of 8 and M a multiple of 128 (prepare_params pads).
    """
    N, K = x.shape
    M = w.shape[1]
    tm = _pick_tile(N, (256, 128, 64, 32, 16, 8))
    tn = _pick_tile(M, (1024, 512, 256, 128))

    def tile_bytes(tm_, tn_):       # double-buffered footprint of one grid step
        return 2 * (tm_ * K * 2 + K * tn_ * 2 + tn_ * 4 + tm_ * tn_ * 4)

    budget = _VMEM_LIMIT // 2
    while tn > 128 and M % (tn // 2) == 0 and tile_bytes(tm, tn) > budget:
        tn //= 2
    while tm > 8 and N % (tm // 2) == 0 and tile_bytes(tm, tn) > budget:
        tm //= 2
    # TODO(synk): add K-tiling with an f32 VMEM accumulator for very large K.

    return pl.pallas_call(
        _linear_kernel,
        out_shape=jax.ShapeDtypeStruct((N, M), jnp.float32),
        grid_spec=pltpu.PrefetchScalarGridSpec(
            num_scalar_prefetch=0,
            grid=(N // tm, M // tn),
            in_specs=[pl.BlockSpec((tm, K), lambda i, j: (i, 0)),
                      pl.BlockSpec((K, tn), lambda i, j: (0, j)),
                      pl.BlockSpec((1, tn), lambda i, j: (0, j))],
            out_specs=pl.BlockSpec((tm, tn), lambda i, j: (i, j))),
        compiler_params=pltpu.CompilerParams(
            dimension_semantics=("parallel", "parallel"),
            vmem_limit_bytes=_VMEM_LIMIT),
    )(x, w, b)


# ----------------------------------------------------------------------------
# Kernel 2: one GRU layer, streamed over (batch block, time chunk).
# Phase 1 (x @ [w_r|w_z|w_h] + b) is fused with the serial recurrence so the
# gate pre-activations never round-trip through HBM.  The hidden state is
# carried across time chunks in a VMEM scratch.
# ----------------------------------------------------------------------------
def _gru_layer_kernel(x_ref, h0_ref, w_all_ref, b_all_ref, u_rz_ref, u_h_ref,
                      y_ref, hT_ref, h_sc, gx_sc):
    T, TB, Inp = x_ref.shape
    Hp = u_h_ref.shape[0]

    # New batch block -> load its initial hidden state into the carry scratch.
    @pl.when(pl.program_id(1) == 0)
    def _():
        h_sc[...] = h0_ref[...]

    # Phase 1: one big MXU matmul for the whole chunk, biases folded in.
    # (Kept f32 in VMEM only; it never touches HBM any more.)
    gx = (jnp.dot(x_ref[...].reshape(T * TB, Inp), w_all_ref[...],
                  preferred_element_type=jnp.float32) + b_all_ref[...])
    gx_sc[...] = gx.reshape(T, TB, 3 * Hp)

    # Phase 2: serial recurrence.  Per step only the two fused hidden-side
    # matmuls run:  h @ [u_r|u_z]  and  (r*h) @ u_h.
    def step(t, h):                                  # h: (TB, Hp) f32
        gx_t = gx_sc[t]                              # (TB, 3Hp) f32
        rz = jax.nn.sigmoid(
            gx_t[:, :2 * Hp]
            + jnp.dot(h.astype(jnp.bfloat16), u_rz_ref[...],
                      preferred_element_type=jnp.float32))
        r = rz[:, :Hp]
        z = rz[:, Hp:]
        h_hat = jnp.tanh(
            gx_t[:, 2 * Hp:]
            + jnp.dot((r * h).astype(jnp.bfloat16), u_h_ref[...],
                      preferred_element_type=jnp.float32))
        h_new = h + z * (h_hat - h)                  # == (1-z)*h + z*h_hat
        y_ref[t] = h_new.astype(y_ref.dtype)
        return h_new

    h_last = jax.lax.fori_loop(0, T, step, h_sc[...])
    h_sc[...] = h_last                               # carry to the next chunk
    hT_ref[...] = h_last                             # last chunk's write wins


def gru_layer(x_bf16, h0, lp, tchunk, tbatch):
    """x_bf16: (S, Bp, Inp) bf16, h0: (Bp, Hp) f32.

    Returns y: (S, Bp, Hp) bf16 (next layer / fc input), hT: (Bp, Hp) f32.
    """
    S, Bp, Inp = x_bf16.shape
    Hp = h0.shape[-1]
    n_b, n_c = Bp // tbatch, S // tchunk

    cost = pl.CostEstimate(
        flops=int(2 * S * Bp * (Inp + Hp) * 3 * Hp),
        transcendentals=int(3 * S * Bp * Hp),
        bytes_accessed=int(S * Bp * (Inp + Hp) * 2 + 2 * Bp * Hp * 4
                           + (Inp * 3 * Hp + 3 * Hp * Hp) * 2 + 3 * Hp * 4))

    y, hT = pl.pallas_call(
        _gru_layer_kernel,
        out_shape=(jax.ShapeDtypeStruct((S, Bp, Hp), jnp.bfloat16),
                   jax.ShapeDtypeStruct((Bp, Hp), jnp.float32)),
        grid_spec=pltpu.PrefetchScalarGridSpec(
            num_scalar_prefetch=0,
            grid=(n_b, n_c),                        # batch blocks x time chunks
            in_specs=[
                pl.BlockSpec((tchunk, tbatch, Inp), lambda b, c: (c, b, 0)),
                pl.BlockSpec((tbatch, Hp),          lambda b, c: (b, 0)),
                # Invariant weights (constant index maps -> DMA'd once).
                # TODO(synk): pipeline_mode=pl.Buffered(1) here would drop the
                #             unused second buffer of each weight.
                pl.BlockSpec((Inp, 3 * Hp),         lambda b, c: (0, 0)),
                pl.BlockSpec((1, 3 * Hp),           lambda b, c: (0, 0)),
                pl.BlockSpec((Hp, 2 * Hp),          lambda b, c: (0, 0)),
                pl.BlockSpec((Hp, Hp),              lambda b, c: (0, 0)),
            ],
            out_specs=(
                pl.BlockSpec((tchunk, tbatch, Hp),  lambda b, c: (c, b, 0)),
                pl.BlockSpec((tbatch, Hp),          lambda b, c: (b, 0)),
            ),
            scratch_shapes=[
                pltpu.VMEM((tbatch, Hp), jnp.float32),              # h carry
                pltpu.VMEM((tchunk, tbatch, 3 * Hp), jnp.float32),  # chunk gx
            ]),
        compiler_params=pltpu.CompilerParams(
            dimension_semantics=("parallel", "arbitrary"),
            vmem_limit_bytes=_VMEM_LIMIT),
        cost_estimate=cost,
    )(x_bf16, h0, lp["w_all"], lp["b_all"], lp["u_rz"], lp["u_h"])
    return y, hT


# ----------------------------------------------------------------------------
# Parameter preparation: pad to TPU-friendly shapes, fuse gates, cast to bf16.
# ----------------------------------------------------------------------------
def prepare_params(params, emb_size, hidden_size, vocab_size, batch_size):
    H, E, V, B = hidden_size, emb_size, vocab_size, batch_size
    Hp, Ep = _round_up(H, 128), _round_up(E, 128)
    Vp = _round_up(V, 512)            # wide lane tiles for the vocab projection
    Bp = _round_up(B, 16)             # full bf16 vregs for the per-step y store

    def pad2(a, r, c):
        return jnp.pad(a, ((0, r - a.shape[0]), (0, c - a.shape[1])))

    layers = []
    for l, p in enumerate(params["layers"]):
        Inp = Ep if l == 0 else Hp
        w_all = jnp.concatenate(
            [pad2(p["w_r"], Inp, Hp), pad2(p["w_z"], Inp, Hp),
             pad2(p["w_h"], Inp, Hp)], axis=1).astype(jnp.bfloat16)
        b_all = jnp.concatenate(
            [pad2(p["b_r"], 1, Hp), pad2(p["b_z"], 1, Hp),
             pad2(p["b_h"], 1, Hp)], axis=1)                       # f32
        u_rz = jnp.concatenate(
            [pad2(p["u_r"], Hp, Hp), pad2(p["u_z"], Hp, Hp)],
            axis=1).astype(jnp.bfloat16)
        u_h = pad2(p["u_h"], Hp, Hp).astype(jnp.bfloat16)
        layers.append({"w_all": w_all, "b_all": b_all,
                       "u_rz": u_rz, "u_h": u_h})

    return {
        "emb": jnp.pad(params["emb"], ((0, 0), (0, Ep - E))),      # f32
        "fc_w": pad2(params["fc_w"], Hp, Vp).astype(jnp.bfloat16),
        "fc_b": pad2(params["fc_b"], 1, Vp),                       # f32
        "layers": layers,
        "dims": dict(H=H, E=E, V=V, B=B, Hp=Hp, Ep=Ep, Vp=Vp, Bp=Bp),
    }


# ----------------------------------------------------------------------------
# Full model forward (embedding gather & layer stacking are plain-JAX glue).
# ----------------------------------------------------------------------------
def gru_forward(inputs, hidden, prepared):
    """inputs: (S, B) int32, hidden: (L, B, H) -> (logits (S,B,V), hidden)."""
    S, B = inputs.shape
    L = hidden.shape[0]
    d = prepared["dims"]
    Bp, Hp, Vp, H, V = d["Bp"], d["Hp"], d["Vp"], d["H"], d["V"]

    # Streaming granularity for the recurrence: small time chunks keep the
    # per-layer VMEM footprint at weights + 2x(x,y) chunks + one gx chunk.
    tchunk = _pick_tile(S, (8, 4, 2))
    tbatch = Bp // 2 if Bp >= 32 else Bp       # >=2 batch blocks when possible

    embs = jnp.take(prepared["emb"], inputs, axis=0)       # (S, B, Ep) f32
    embs = jnp.pad(embs, ((0, 0), (0, Bp - B), (0, 0)))
    x = embs.astype(jnp.bfloat16)                          # dropout == identity

    hidden_p = jnp.pad(hidden, ((0, 0), (0, Bp - B), (0, Hp - H)))

    new_hidden = []
    for l in range(L):
        x, hT = gru_layer(x, hidden_p[l], prepared["layers"][l], tchunk, tbatch)
        new_hidden.append(hT)
    hidden_out = jnp.stack(new_hidden)[:, :B, :H]

    logits = linear(x.reshape(S * Bp, Hp), prepared["fc_w"], prepared["fc_b"])
    logits = logits.reshape(S, Bp, Vp)[:, :B, :V]
    return logits, hidden_out


# ----------------------------------------------------------------------------
# Deterministic parameter init (mirrors the PyTorch init ranges).
# ----------------------------------------------------------------------------
def init_params(key, emb_size, hidden_size, vocab_size, num_layers):
    s = 1.0 / (hidden_size ** 0.5)
    keys = jax.random.split(key, 3 + num_layers)
    params = {
        "emb": jax.random.uniform(keys[0], (vocab_size, emb_size),
                                  jnp.float32, -0.1, 0.1),
        "fc_w": jax.random.uniform(keys[1], (hidden_size, vocab_size),
                                   jnp.float32, -0.1, 0.1),
        "fc_b": jnp.zeros((1, vocab_size), jnp.float32),
        "layers": [],
    }
    for l in range(num_layers):
        in_size = emb_size if l == 0 else hidden_size
        lk = jax.random.split(keys[3 + l], 9)
        u = lambda k, shp: jax.random.uniform(k, shp, jnp.float32, -s, s)
        params["layers"].append({
            "w_r": u(lk[0], (in_size, hidden_size)),
            "w_z": u(lk[1], (in_size, hidden_size)),
            "w_h": u(lk[2], (in_size, hidden_size)),
            "u_r": u(lk[3], (hidden_size, hidden_size)),
            "u_z": u(lk[4], (hidden_size, hidden_size)),
            "u_h": u(lk[5], (hidden_size, hidden_size)),
            "b_r": u(lk[6], (1, hidden_size)),
            "b_z": u(lk[7], (1, hidden_size)),
            "b_h": u(lk[8], (1, hidden_size)),
        })
    return params


# ----------------------------------------------------------------------------
# Pure-JAX reference.  bf16_matmul=True mirrors the kernels' bf16-input /
# f32-accumulate matmuls; False is the exact f32 semantics of the module.
# ----------------------------------------------------------------------------
def gru_forward_ref(inputs, hidden, params, bf16_matmul=False):
    def mm(a, b):
        if bf16_matmul:
            return jnp.dot(a.astype(jnp.bfloat16), b.astype(jnp.bfloat16),
                           preferred_element_type=jnp.float32)
        return jnp.dot(a, b)

    embs = jnp.take(params["emb"], inputs, axis=0)
    S = inputs.shape[0]
    logits = []
    for t in range(S):
        y = embs[t]
        new_hidden = []
        for l, p in enumerate(params["layers"]):
            h = hidden[l]
            r = jax.nn.sigmoid(mm(y, p["w_r"]) + mm(h, p["u_r"]) + p["b_r"])
            z = jax.nn.sigmoid(mm(y, p["w_z"]) + mm(h, p["u_z"]) + p["b_z"])
            hh = jnp.tanh(mm(y, p["w_h"]) + mm(r * h, p["u_h"]) + p["b_h"])
            h_new = (1.0 - z) * h + z * hh
            new_hidden.append(h_new)
            y = h_new
        hidden = jnp.stack(new_hidden)
        logits.append(mm(y, params["fc_w"]) + params["fc_b"])
    return jnp.stack(logits), hidden


if __name__ == "__main__":
    # Small, deterministic shapes consistent with the module.  Chosen so the
    # recurrence grid has >1 time chunk and >1 batch block, and the vocab
    # projection uses multiple row and column tiles.
    emb_size, hidden_size = 32, 48
    seq_len, batch_size = 16, 20
    vocab_size, num_layers = 1100, 2
    # dp_keep_prob = 1.0 -> dropout is identity.

    key = jax.random.PRNGKey(0)
    pkey, ikey = jax.random.split(key)
    params = init_params(pkey, emb_size, hidden_size, vocab_size, num_layers)
    prepared = prepare_params(params, emb_size, hidden_size, vocab_size,
                              batch_size)

    inputs = jax.random.randint(ikey, (seq_len, batch_size), 0, vocab_size,
                                dtype=jnp.int32)
    hidden0 = jnp.zeros((num_layers, batch_size, hidden_size), jnp.float32)

    logits, hidden_out = gru_forward(inputs, hidden0, prepared)
    logits = jax.block_until_ready(logits)
    hidden_out = jax.block_until_ready(hidden_out)

    assert logits.shape == (seq_len, batch_size, vocab_size)
    assert hidden_out.shape == (num_layers, batch_size, hidden_size)

    # (a) tight check against a reference using the same bf16-input matmuls.
    ref_l_bf, ref_h_bf = gru_forward_ref(inputs, hidden0, params,
                                         bf16_matmul=True)
    assert jnp.allclose(logits, ref_l_bf, atol=2e-3, rtol=2e-3)
    assert jnp.allclose(hidden_out, ref_h_bf, atol=2e-3, rtol=2e-3)

    # (b) close to the exact f32 semantics of the PyTorch module
    #     (bf16 matmul inputs introduce ~1e-2 absolute error at these scales).
    ref_l, ref_h = gru_forward_ref(inputs, hidden0, params, bf16_matmul=False)
    assert jnp.allclose(logits, ref_l, atol=3e-2, rtol=3e-2)
    assert jnp.allclose(hidden_out, ref_h, atol=3e-2, rtol=3e-2)

    print("KERNEL_OK")
</pallas_src>

<mosaic_0001>
module attributes {stable_mosaic.version = 11 : i64} {
  func.func @_gru_layer_kernel(%arg0: i32, %arg1: i32, %arg2: memref<8x16x128xbf16, #tpu.memory_space<vmem>>, %arg3: memref<16x128xf32, #tpu.memory_space<vmem>>, %arg4: memref<128x384xbf16, #tpu.memory_space<vmem>>, %arg5: memref<1x384xf32, #tpu.memory_space<vmem>>, %arg6: memref<128x256xbf16, #tpu.memory_space<vmem>>, %arg7: memref<128x128xbf16, #tpu.memory_space<vmem>>, %arg8: memref<8x16x128xbf16, #tpu.memory_space<vmem>>, %arg9: memref<16x128xf32, #tpu.memory_space<vmem>>, %arg10: memref<16x128xf32, #tpu.memory_space<vmem>>, %arg11: memref<8x16x384xf32, #tpu.memory_space<vmem>>) attributes {dimension_semantics = [#tpu.dimension_semantics<parallel>, #tpu.dimension_semantics<arbitrary>], iteration_bounds = array<i64: 2, 2>, scalar_prefetch = 0 : i64, scratch_operands = 2 : i64, tpu.core_type = #tpu.core_type<tc>, window_params = [{transform_indices = @transform_0, window_bounds = array<i64: 8, 16, 128>}, {transform_indices = @transform_1, window_bounds = array<i64: 16, 128>}, {pipeline_mode = #tpu.pipeline_mode<synchronous>, transform_indices = @transform_2, window_bounds = array<i64: 128, 384>}, {pipeline_mode = #tpu.pipeline_mode<synchronous>, transform_indices = @transform_3, window_bounds = array<i64: 1, 384>}, {pipeline_mode = #tpu.pipeline_mode<synchronous>, transform_indices = @transform_4, window_bounds = array<i64: 128, 256>}, {pipeline_mode = #tpu.pipeline_mode<synchronous>, transform_indices = @transform_5, window_bounds = array<i64: 128, 128>}, {transform_indices = @transform_6, window_bounds = array<i64: 8, 16, 128>}, {transform_indices = @transform_7, window_bounds = array<i64: 16, 128>}]} {
    %c0_i32 = arith.constant 0 : i32
    %0 = arith.cmpi eq, %arg1, %c0_i32 : i32
    %1 = arith.extui %0 : i1 to i32
    %c0_i32_0 = arith.constant 0 : i32
    %2 = arith.cmpi ne, %1, %c0_i32_0 : i32
    scf.if %2 {
      %c0_18 = arith.constant 0 : index
      %c0_19 = arith.constant 0 : index
      %17 = vector.load %arg3[%c0_18, %c0_19] : memref<16x128xf32, #tpu.memory_space<vmem>>, vector<16x128xf32>
      %c0_20 = arith.constant 0 : index
      %c0_21 = arith.constant 0 : index
      %18 = vector.load %arg10[%c0_20, %c0_21] : memref<16x128xf32, #tpu.memory_space<vmem>>, vector<16x128xf32>
      tpu.vector_store %arg10[%c0_20, %c0_21], %17 {strides = array<i32>} : memref<16x128xf32, #tpu.memory_space<vmem>>, vector<16x128xf32>,
    } else {
    }
    %c0 = arith.constant 0 : index
    %c0_1 = arith.constant 0 : index
    %c0_2 = arith.constant 0 : index
    %3 = vector.load %arg2[%c0, %c0_1, %c0_2] : memref<8x16x128xbf16, #tpu.memory_space<vmem>>, vector<8x16x128xbf16>
    %4 = vector.shape_cast %3 : vector<8x16x128xbf16> to vector<128x128xbf16>
    %c0_3 = arith.constant 0 : index
    %c0_4 = arith.constant 0 : index
    %5 = vector.load %arg4[%c0_3, %c0_4] : memref<128x384xbf16, #tpu.memory_space<vmem>>, vector<128x384xbf16>
    %cst = arith.constant dense<0.000000e+00> : vector<128x384xf32>
    %6 = tpu.matmul %4, %5, %cst {dimension_numbers = #tpu.dot_dimension_numbers<[1], [0], [0], [1], [0, 0, 1, 1], [], []>} : vector<128x128xbf16>, vector<128x384xbf16>, vector<128x384xf32> -> vector<128x384xf32>
    %c0_5 = arith.constant 0 : index
    %c0_6 = arith.constant 0 : index
    %7 = vector.load %arg5[%c0_5, %c0_6] : memref<1x384xf32, #tpu.memory_space<vmem>>, vector<1x384xf32>
    %8 = vector.broadcast %7 : vector<1x384xf32> to vector<128x384xf32>
    %9 = arith.addf %6, %8 : vector<128x384xf32>
    %10 = vector.shape_cast %9 : vector<128x384xf32> to vector<8x16x384xf32>
    %c0_7 = arith.constant 0 : index
    %c0_8 = arith.constant 0 : index
    %c0_9 = arith.constant 0 : index
    %11 = vector.load %arg11[%c0_7, %c0_8, %c0_9] : memref<8x16x384xf32, #tpu.memory_space<vmem>>, vector<8x16x384xf32>
    tpu.vector_store %arg11[%c0_7, %c0_8, %c0_9], %10 {strides = array<i32>} : memref<8x16x384xf32, #tpu.memory_space<vmem>>, vector<8x16x384xf32>,
    %c0_10 = arith.constant 0 : index
    %c0_11 = arith.constant 0 : index
    %12 = vector.load %arg10[%c0_10, %c0_11] : memref<16x128xf32, #tpu.memory_space<vmem>>, vector<16x128xf32>
    %c0_i32_12 = arith.constant 0 : i32
    %c8_i32 = arith.constant 8 : i32
    %13 = arith.addi %c0_i32_12, %c8_i32 : i32
    %c1_i32 = arith.constant 1 : i32
    %14 = scf.for %arg12 = %c0_i32_12 to %13 step %c1_i32 iter_args(%arg13 = %12) -> (vector<16x128xf32>)  : i32 {
      %17 = arith.index_cast %arg12 : i32 to index
      %c0_18 = arith.constant 0 : index
      %c0_19 = arith.constant 0 : index
      %18 = vector.load %arg11[%17, %c0_18, %c0_19] : memref<8x16x384xf32, #tpu.memory_space<vmem>>, vector<1x16x384xf32>
      %19 = vector.shape_cast %18 : vector<1x16x384xf32> to vector<16x384xf32>
      %20 = vector.extract_strided_slice %19 {offsets = [0, 0], sizes = [16, 256], strides = [1, 1]} : vector<16x384xf32> to vector<16x256xf32>
      %21 = arith.truncf %arg13 : vector<16x128xf32> to vector<16x128xbf16>
      %c0_20 = arith.constant 0 : index
      %c0_21 = arith.constant 0 : index
      %22 = vector.load %arg6[%c0_20, %c0_21] : memref<128x256xbf16, #tpu.memory_space<vmem>>, vector<128x256xbf16>
      %cst_22 = arith.constant dense<0.000000e+00> : vector<16x256xf32>
      %23 = tpu.matmul %21, %22, %cst_22 {dimension_numbers = #tpu.dot_dimension_numbers<[1], [0], [0], [1], [0, 0, 1, 1], [], []>} : vector<16x128xbf16>, vector<128x256xbf16>, vector<16x256xf32> -> vector<16x256xf32>
      %24 = arith.addf %20, %23 : vector<16x256xf32>
      %25 = arith.negf %24 : vector<16x256xf32>
      %26 = math.exp %25 : vector<16x256xf32>
      %cst_23 = arith.constant 1.000000e+00 : f32
      %27 = vector.broadcast %cst_23 : f32 to vector<16x256xf32>
      %28 = arith.addf %27, %26 : vector<16x256xf32>
      %29 = arith.divf %27, %28 : vector<16x256xf32>
      %30 = vector.extract_strided_slice %29 {offsets = [0, 0], sizes = [16, 128], strides = [1, 1]} : vector<16x256xf32> to vector<16x128xf32>
      %31 = vector.extract_strided_slice %29 {offsets = [0, 128], sizes = [16, 128], strides = [1, 1]} : vector<16x256xf32> to vector<16x128xf32>
      %32 = vector.extract_strided_slice %19 {offsets = [0, 256], sizes = [16, 128], strides = [1, 1]} : vector<16x384xf32> to vector<16x128xf32>
      %33 = arith.mulf %30, %arg13 : vector<16x128xf32>
      %34 = arith.truncf %33 : vector<16x128xf32> to vector<16x128xbf16>
      %c0_24 = arith.constant 0 : index
      %c0_25 = arith.constant 0 : index
      %35 = vector.load %arg7[%c0_24, %c0_25] : memref<128x128xbf16, #tpu.memory_space<vmem>>, vector<128x128xbf16>
      %cst_26 = arith.constant dense<0.000000e+00> : vector<16x128xf32>
      %36 = tpu.matmul %34, %35, %cst_26 {dimension_numbers = #tpu.dot_dimension_numbers<[1], [0], [0], [1], [0, 0, 1, 1], [], []>} : vector<16x128xbf16>, vector<128x128xbf16>, vector<16x128xf32> -> vector<16x128xf32>
      %37 = arith.addf %32, %36 : vector<16x128xf32>
      %38 = math.tanh %37 : vector<16x128xf32>
      %39 = arith.subf %38, %arg13 : vector<16x128xf32>
      %40 = arith.mulf %31, %39 : vector<16x128xf32>
      %41 = arith.addf %arg13, %40 : vector<16x128xf32>
      %42 = arith.truncf %41 : vector<16x128xf32> to vector<16x128xbf16>
      %43 = arith.index_cast %arg12 : i32 to index
      %c0_27 = arith.constant 0 : index
      %c0_28 = arith.constant 0 : index
      %44 = vector.load %arg8[%43, %c0_27, %c0_28] : memref<8x16x128xbf16, #tpu.memory_space<vmem>>, vector<1x16x128xbf16>
      %45 = vector.shape_cast %44 : vector<1x16x128xbf16> to vector<16x128xbf16>
      %46 = vector.shape_cast %42 : vector<16x128xbf16> to vector<1x16x128xbf16>
      tpu.vector_store %arg8[%43, %c0_27, %c0_28], %46 {strides = array<i32>} : memref<8x16x128xbf16, #tpu.memory_space<vmem>>, vector<1x16x128xbf16>,
      scf.yield %41 : vector<16x128xf32>
    }
    %c8_i32_13 = arith.constant 8 : i32
    %c0_14 = arith.constant 0 : index
    %c0_15 = arith.constant 0 : index
    %15 = vector.load %arg10[%c0_14, %c0_15] : memref<16x128xf32, #tpu.memory_space<vmem>>, vector<16x128xf32>
    tpu.vector_store %arg10[%c0_14, %c0_15], %14 {strides = array<i32>} : memref<16x128xf32, #tpu.memory_space<vmem>>, vector<16x128xf32>,
    %c0_16 = arith.constant 0 : index
    %c0_17 = arith.constant 0 : index
    %16 = vector.load %arg9[%c0_16, %c0_17] : memref<16x128xf32, #tpu.memory_space<vmem>>, vector<16x128xf32>
    tpu.vector_store %arg9[%c0_16, %c0_17], %14 {strides = array<i32>} : memref<16x128xf32, #tpu.memory_space<vmem>>, vector<16x128xf32>,
    return
  }
  func.func @transform_0(%arg0: i32, %arg1: i32) -> (i32, i32, i32) {
    %c0_i32 = arith.constant 0 : i32
    %c0_i32_0 = arith.constant 0 : i32
    return %arg1, %arg0, %c0_i32 : i32, i32, i32
  }
  func.func @transform_1(%arg0: i32, %arg1: i32) -> (i32, i32) {
    %c0_i32 = arith.constant 0 : i32
    %c0_i32_0 = arith.constant 0 : i32
    return %arg0, %c0_i32 : i32, i32
  }
  func.func @transform_2(%arg0: i32, %arg1: i32) -> (i32, i32) {
    %c0_i32 = arith.constant 0 : i32
    %c0_i32_0 = arith.constant 0 : i32
    %c0_i32_1 = arith.constant 0 : i32
    return %c0_i32, %c0_i32_0 : i32, i32
  }
  func.func @transform_3(%arg0: i32, %arg1: i32) -> (i32, i32) {
    %c0_i32 = arith.constant 0 : i32
    %c0_i32_0 = arith.constant 0 : i32
    %c0_i32_1 = arith.constant 0 : i32
    return %c0_i32, %c0_i32_0 : i32, i32
  }
  func.func @transform_4(%arg0: i32, %arg1: i32) -> (i32, i32) {
    %c0_i32 = arith.constant 0 : i32
    %c0_i32_0 = arith.constant 0 : i32
    %c0_i32_1 = arith.constant 0 : i32
    return %c0_i32, %c0_i32_0 : i32, i32
  }
  func.func @transform_5(%arg0: i32, %arg1: i32) -> (i32, i32) {
    %c0_i32 = arith.constant 0 : i32
    %c0_i32_0 = arith.constant 0 : i32
    %c0_i32_1 = arith.constant 0 : i32
    return %c0_i32, %c0_i32_0 : i32, i32
  }
  func.func @transform_6(%arg0: i32, %arg1: i32) -> (i32, i32, i32) {
    %c0_i32 = arith.constant 0 : i32
    %c0_i32_0 = arith.constant 0 : i32
    return %arg1, %arg0, %c0_i32 : i32, i32, i32
  }
  func.func @transform_7(%arg0: i32, %arg1: i32) -> (i32, i32) {
    %c0_i32 = arith.constant 0 : i32
    %c0_i32_0 = arith.constant 0 : i32
    return %arg0, %c0_i32 : i32, i32
  }
}

</mosaic_0001>

<bundles_post_ra>
// kernel: tpu_custom_call.1
= control target key start
LH: loop header
LB: loop body
LE: loop exit
PB: predicated region body
PF: predicated region fallthrough
CT: control target
= control target key end

     0   :  { %s2892_s0 = inlined_call_operand.hbm [shape: bf16[16,32,128], index: 0, kind: input, shape index: {}]   ;;  %s2893_s1 = inlined_call_operand.hbm [shape: f32[32,128], index: 1, kind: input, shape index: {}]   ;;  %s2894_s2 = inlined_call_operand.hbm [shape: bf16[128,384], index: 2, kind: input, shape index: {}]   ;;  %s2895_s3 = inlined_call_operand.vmem [shape: f32[1,384], index: 3, kind: input, shape index: {}]   ;;  %s2896_s4 = inlined_call_operand.hbm [shape: bf16[128,256], index: 4, kind: input, shape index: {}]   ;;  %s2897_s5 = inlined_call_operand.hbm [shape: bf16[128,128], index: 5, kind: input, shape index: {}]   ;;  %s2898_s6 = inlined_call_operand.hbm [shape: bf16[16,32,128], index: 6, kind: output, shape index: {0}]   ;;  %s2899_s7 = inlined_call_operand.hbm [shape: f32[32,128], index: 7, kind: output, shape index: {1}]  }
   0x1   :  { %2925 = sst [smem:[#allocation41_spill]] %s2895_s3 }
   0x2   :  { %2926 = sst [smem:[#allocation42_spill]] %s2896_s4 }
   0x3   :  { %2927 = sst [smem:[#allocation43_spill]] %s2898_s6 }
   0x4   :  { %2928 = sst [smem:[#allocation44_spill]] %s2899_s7 }
   0x5   :  { %13 = vsyncpa [#allocation5], 0 }
   0x6   :  { %15 = vsyncpa [#allocation5 + $0x1], 0 }
   0x7   :  { %16 = vsyncpa [#allocation8], 0 }
   0x8   :  { %18 = vsyncpa [#allocation8 + $0x1], 0 }
   0x9   :  { %19 = vsyncpa [#allocation11], 0 }
   0xa   :  { %20 = vsyncpa [#allocation6], 0 }
   0xb   :  { %22 = vsyncpa [#allocation6 + $0x1], 0 }
   0xc   :  { %23 = vsyncpa [#allocation15], 0 }
   0xd   :  { %25 = vsyncpa [#allocation15 + $0x1], 0  ;;  %s2356_s24 = smov 0   ;;  %s2358_s25 = smov 0  }
   0xe   :  { %s2360_s26 = smov 0   ;;  %s2362_s27 = smov 0  }
   0xf   :  { %s2364_s28 = smov 0   ;;  %s2366_s29 = smov 0  }
  0x10   :  { %s2368_s30 = smov 0   ;;  %s2370_s8 = smov 0  }
  0x11   :  { %s2372_s9 = smov 0   ;;  %s2374_s10 = smov 0  }
  0x12   :  { %s2376_s11 = smov 0  }
  0x13 LB: > { %2929 = sst [smem:[#allocation27_spill]] %s2230_s24  ;;  %s2412_s12 = sadd.s32 4294967295, %s2270_s11   ;;  %s2270_s11 = sphi %s2376_s11, %s31_s11   ;;  %s2266_s10 = sphi %s2374_s10, %s3001_s10   ;;  %s2262_s9 = sphi %s2372_s9, %s3000_s9   ;;  %s2258_s8 = sphi %s2370_s8, %s2999_s8   ;;  %s2254_s30 = sphi %s2368_s30, %s2998_s30   ;;  %s2250_s29 = sphi %s2366_s29, %s2997_s29   ;;  %s2246_s28 = sphi %s2364_s28, %s2996_s28   ;;  %s2242_s27 = sphi %s2362_s27, %s2995_s27   ;;  %s2238_s26 = sphi %s2360_s26, %s2994_s26   ;;  %s2234_s25 = sphi %s2358_s25, %s2993_s25   ;;  %s2230_s24 = sphi %s2356_s24, %s2988_s24  }
  0x14   : > { %2930 = sst [smem:[#allocation28_spill]] %s2234_s25  ;;  %s1527_s13 = sadd.s32 4294967294, %s2270_s11  }
  0x15   : > { %2931 = sst [smem:[#allocation29_spill]] %s2242_s27  ;;  %s40_s14 = sadd.s32 1, %s2262_s9 }
  0x16   : > { %2932 = sst [smem:[#allocation30_spill]] %s2254_s30  ;;  %s43_s15 = sadd.s32 1, %s2266_s10 }
  0x17   : > { %2933 = sst [smem:[#allocation31_spill]] %s2258_s8  ;;  %p41_p0 = scmp.ge.s32.totalorder %s40_s14, 2 }
  0x18   : > { %s52_s16 = sadd.s32 1, %s2250_s29  ;;  %p59_p1 = scmp.ne.s32.totalorder %s2250_s29, %s2246_s28 }
  0x19   : > { %p60_p2 = scmp.eq.s32.totalorder %s2270_s11, 0  ;;  %s3003_s14 = smov (%p41_p0, %s40_s14), 0 }
  0x1a   : > { %2934 = sst [smem:[#allocation32_spill]] %s3003_s14  ;;  %s3005_s15 = smov (!%p41_p0, %s43_s15), %s2266_s10 }
  0x1b   : > { %s47_s17 = ssub.s32 %s2262_s9, %s3003_s14  ;;  %p2431_p3 = por %p60_p2, %p59_p1 }
  0x1c   : > { %p45_p4 = scmp.ge.s32.totalorder %s3005_s15, 2  ;;  %p2903_p5 = scmp.ne.s32.totalorder %s2246_s28, %s2242_s27 }
  0x1d   : > { %s2935_s18 = scalar_select %p2431_p3, 1, 0 }
  0x1e   : > { %p2905_p6 = scmp.eq.s32.totalorder %s2412_s12, 0  ;;  %s78_s19 = sadd.s32 1, %s2238_s26 }
  0x1f   : > { %s3007_s15 = smov (%p45_p4, %s3005_s15), 0  ;;  %p85_p8 = scmp.ne.s32.totalorder %s2238_s26, %s2234_s25 }
  0x20   : > { %2936 = sst [smem:[#allocation33_spill]] %s3007_s15  ;;  %p2446_p7 = por %p2905_p6, %p2903_p5 }
  0x21   : > { %s48_s21 = ssub.s32 %s2266_s10, %s3007_s15  ;;  %p91_p9 = scmp.ne.s32.totalorder %s2234_s25, %s2230_s24 }
  0x22   : > { %s2937_s20 = scalar_select %p2446_p7, 1, 0 }
  0x23   : > { %s49_s22 = sor.u32 %s48_s21, %s47_s17  ;;  %p76_p10 = scmp.eq.s32.totalorder %s48_s21, 0 }
  0x24   : > { %p50_p11 = scmp.eq.s32.totalorder %s49_s22, 0  ;;  %p2461_p12 = por %p85_p8, %p60_p2 }
  0x25   : > { %s2466_s14 = scalar_select %p76_p10, %s2238_s26, %s78_s19  }
  0x26   : > { %s2938_s23 = scalar_select %p2461_p12, 1, 0 }
  0x27   : > { %2939 = sst [smem:[#allocation34_spill]] %s2466_s14  ;;  %p2476_p13 = por %p91_p9, %p2905_p6 }
  0x28   : > { %s2469_s7 = scalar_select %p50_p11, %s2250_s29, %s52_s16  }
  0x29   : > { %s2941_s15 = scalar_select %p2476_p13, 1, 0 }
  0x2a   : > { %2940 = sst [smem:[#allocation35_spill]] %s2469_s7  ;;  %p201_p0 = scmp.eq.s32.totalorder %s2412_s12, 3 }
  0x2b   : > { %2942 = sst [smem:[#allocation36_spill]] %s2941_s15  ;;  %p207_p4 = scmp.eq.s32.totalorder %s1527_s13, 3 }
  0x2c   : > { %p1528_p5 = scmp.ge.s32.totalorder %s2270_s11, 1  ;;  %p2485_p7 = por %p201_p0, %p59_p1 }
  0x2d   : > { %p2492_p2 = por %p201_p0, %p85_p8  ;;  %p2947_p10 = scmp.ne.s32.totalorder %s2246_s28, %s2242_s27 }
  0x2e   : > { %s2943_s17 = scalar_select %p2485_p7, 1, 0 }
  0x2f   : > { %s2945_s19 = scalar_select %p2492_p2, 1, 0 }
  0x30   : > { %2944 = sst [smem:[#allocation37_spill]] %s2943_s17  ;;  %p2499_p11 = por %p207_p4, %p2947_p10 }
  0x31   : > { %2946 = sst [smem:[#allocation38_spill]] %s2945_s19  ;;  %p2506_p6 = por %p207_p4, %p91_p9 }
  0x32   : > { %s2948_s16 = scalar_select %p2499_p11, 1, 0 }
  0x33   : > { %s2950_s21 = scalar_select %p2506_p6, 1, 0 }
  0x34   : > { %2949 = sst [smem:[#allocation39_spill]] %s2948_s16  ;;  %p240_p13 = scmp.lt.s32.totalorder %s2270_s11, 5 }
  0x35   : > { %2951 = sst [smem:[#allocation40_spill]] %s2950_s21  ;;  %s2284_s22 = smov [#allocation10]  }
  0x36   : > { %p2511_p1 = pnand %p1528_p5, %p240_p13  ;;  %s268_s7 = sshll.u32 %s2284_s22, 4  ;;  %s269_s7 = int_to_ptr.vmem [resolvable:$true] %s268_s7 }
  0x37   : > { %p2953_p0 = scmp.eq.s32.totalorder %s2412_s12, 0  ;;  %s2285_s24 = smov [#allocation9]  }
  0x38   : > { %s2952_s13 = scalar_select %p2511_p1, 1, 0 }
  0x39   : > { %p1750_p8 = pneg %p2511_p1  ;;  %s252_s16 = sshll.u32 %s2285_s24, 4  ;;  %s253_s16 = int_to_ptr.vmem [resolvable:$true] %s252_s16 }
  0x3a   : > { %s2955_s4 = sld [smem:[#allocation42_spill]] }
  0x3b   : > { %p2519_p10 = pnand %p1750_p8, %p2953_p0 }
  0x3d   : > { %p2531_p9 = pneg %p2519_p10 }
  0x40   : > { %s2008_s19 = scalar_lea.hbm %s2955_s4, 2048 }
  0x41   : > { %p2009_p5 = scmp.ne.s32.totalorder %s2955_s4, %s2008_s19  ;;  %p2015_p8 = scmp.lt.u32.totalorder %s2008_s19, %s2955_s4 }
  0x43   : > { %p2011_p13 = pnand %p2531_p9, %p2009_p5 }
  0x45   : > { %p2012_p4 = pneg %p2011_p13 }
  0x47   : > { %p2017_p0 = pnand %p2015_p8, %p2012_p4 }
  0x49   : > { %2020 = shalt.err (!%p2017_p0)
}
  0x4a   : > { %s2021_s24 = scalar_lea.vmem %s269_s7, 2048  ;;  %p2029_p7 = scmp.lt.s32.totalorder %s269_s7, %s269_s7 }
  0x4b   : > { %p2022_p6 = scmp.ne.s32.totalorder %s269_s7, %s2021_s24  ;;  %p2030_p1 = scmp.lt.s32.totalorder %s2021_s24, %s2021_s24 }
  0x4d   : > { %p2024_p11 = pnand %p2022_p6, %p2531_p9  ;;  %p2031_p12 = por %p2030_p1, %p2029_p7 }
  0x4f   : > { %p2025_p2 = pneg %p2024_p11 }
  0x51   : > { %p2032_p3 = pnand %p2031_p12, %p2025_p2 }
  0x53   : > { %2035 = shalt.err (!%p2032_p3)
}
  0x54   : > { %s2286_s6 = smov 128   ;;  %s2287_s27 = smov 8  }
  0x55   : > { %1756 = dma.hbm_to_vmem [thread:$0]  (!%p2519_p10), %s2955_s4, 2048, %s269_s7, [#allocation11], %s2286_s6, %s2286_s6, %s2287_s27  }
  0x56   : > { %s2036_s21 = scalar_lea.hbm %s2894_s2, 3072 }
  0x57   : > { %p2037_p6 = scmp.ne.s32.totalorder %s2894_s2, %s2036_s21  ;;  %p2043_p12 = scmp.lt.u32.totalorder %s2036_s21, %s2894_s2 }
  0x59   : > { %p2039_p3 = pnand %p2037_p6, %p2531_p9 }
  0x5b   : > { %p2040_p7 = pneg %p2039_p3 }
  0x5d   : > { %p2045_p2 = pnand %p2043_p12, %p2040_p7 }
  0x5f   : > { %2048 = shalt.err (!%p2045_p2)
}
  0x60   : > { %s2049_s3 = scalar_lea.vmem %s253_s16, 3072  ;;  %p2057_p13 = scmp.lt.s32.totalorder %s253_s16, %s253_s16 }
  0x61   : > { %p2050_p11 = scmp.ne.s32.totalorder %s253_s16, %s2049_s3  ;;  %p2058_p4 = scmp.lt.s32.totalorder %s2049_s3, %s2049_s3 }
  0x63   : > { %p2052_p1 = pnand %p2050_p11, %p2531_p9  ;;  %p2059_p8 = por %p2058_p4, %p2057_p13 }
  0x65   : > { %p2053_p5 = pneg %p2052_p1 }
  0x67   : > { %p2060_p0 = pnand %p2059_p8, %p2053_p5 }
  0x69   : > { %2063 = shalt.err (!%p2060_p0)
}
  0x6a   : > { %s2288_s7 = smov 192   ;;  %s2289_s30 = smov 12  }
  0x6b   : > { %1753 = dma.hbm_to_vmem [thread:$0]  (!%p2519_p10), %s2894_s2, 3072, %s253_s16, [#allocation8], %s2288_s7, %s2288_s7, %s2289_s30  }
  0x6c   : > { %s2290_s6 = smov [#allocation12]   ;;  %s2064_s19 = scalar_lea.hbm %s2897_s5, 1024 }
  0x6d   : > { %s281_s27 = sshll.u32 %s2290_s6, 4  ;;  %p2065_p6 = scmp.ne.s32.totalorder %s2897_s5, %s2064_s19  ;;  %s282_s27 = int_to_ptr.vmem [resolvable:$true] %s281_s27 }
  0x6e   : > { %p2071_p12 = scmp.lt.u32.totalorder %s2064_s19, %s2897_s5 }
  0x6f   : > { %p2067_p3 = pnand %p2065_p6, %p2531_p9 }
  0x71   : > { %p2068_p7 = pneg %p2067_p3 }
  0x73   : > { %p2073_p2 = pnand %p2071_p12, %p2068_p7 }
  0x75   : > { %2076 = shalt.err (!%p2073_p2)
}
  0x76   : > { %s2077_s16 = scalar_lea.vmem %s282_s27, 1024  ;;  %p2085_p13 = scmp.lt.s32.totalorder %s282_s27, %s282_s27 }
  0x77   : > { %p2078_p11 = scmp.ne.s32.totalorder %s282_s27, %s2077_s16  ;;  %p2086_p4 = scmp.lt.s32.totalorder %s2077_s16, %s2077_s16 }
  0x79   : > { %p2080_p1 = pnand %p2078_p11, %p2531_p9  ;;  %p2087_p8 = por %p2086_p4, %p2085_p13 }
  0x7b   : > { %p2081_p5 = pneg %p2080_p1 }
  0x7d   : > { %p2088_p0 = pnand %p2087_p8, %p2081_p5 }
  0x7f   : > { %2091 = shalt.err (!%p2088_p0)
}
  0x80   : > { %s2291_s7 = smov 64   ;;  %s2292_s30 = smov 4  }
  0x81   : > { %1759 = dma.hbm_to_vmem [thread:$0]  (!%p2519_p10), %s2897_s5, 1024, %s282_s27, [#allocation11], %s2291_s7, %s2291_s7, %s2292_s30  }
  0x82   : > { %p1532_p6 = scmp.ge.s32.totalorder %s2270_s11, 4 }
  0x84   : > { %291 = sbr.rel (%p1532_p6) target bundleno = 181 (0xb5), region = 32 }
  0x8b   : > { %s295_s22 = sand.u32 1, %s2250_s29   ;;  %s1535_s15 = sshll.u32 %s2266_s10, 1 }
  0x8c   : > { %s1533_s6 = sshll.u32 %s295_s22, 6  ;;  %s1627_s8 = sshll.u32 %s2262_s9, 5 }
  0x8d   : > { %s306_s14 = sadd.s32 %s1627_s8, %s1535_s15  ;;  %s299_s17 = scalar_lea.vmem [#allocation4], %s1533_s6 }
  0x8e   : > { %s321_s19 = sshll.u32 %s299_s17, 4  ;;  %s1537_s27 = sshll.u32 %s306_s14, 6  ;;  %s322_s19 = int_to_ptr.vmem [resolvable:$true] %s321_s19 }
  0x8f   : > { %p2957_p10 = scmp.ne.s32.totalorder %s2935_s18, 0  ;;  %s2293_s24 = smov 256  }
  0x90   : > { %s2294_s16 = smov 128   ;;  %s2295_s7 = smov 2  }
  0x91   : > { %s1723_s21 = scalar_select %p2957_p10, [#allocation0], [#allocation20] }
  0x92   : > { %1724 = sst [smem:[#allocation17]] (%p2957_p10), %s2293_s24  ;;  %s2296_s30 = smov 64  }
  0x93   : > { %s313_s3 = sld [smem:[%s1723_s21]]   ;;  %s308_s15 = scalar_lea.hbm %s2892_s0, %s1537_s27 }
  0x94   : > { %1725 = sst [smem:[#allocation17 + $0x1]] (%p2957_p10), %s2294_s16  ;;  %s2297_s6 = smov 4  }
  0x95   : > { %1726 = sst [smem:[#allocation17 + $0x2]] (%p2957_p10), %s2295_s7  ;;  %s296_s17 = scalar_lea.sflag [#allocation5], %s295_s22 }
  0x96   : > { %1727 = sst [smem:[#allocation17 + $0x3]] (%p2957_p10), %s2296_s30  ;;  %s2298_s21 = smov [#allocation16]  }
  0x97   : > { %1728 = sst [smem:[#allocation17 + $0x4]] (%p2957_p10), %s2296_s30  ;;  %s344_s24 = sand.u32 1, %s2270_s11  }
  0x98   : > { %1729 = sst [smem:[#allocation17 + $0x5]] (%p2957_p10), %s2297_s6  ;;  %s346_s16 = sand.u32 1, %s2238_s26  }
  0x99   : > { %s1538_s8 = sshll.u32 %s313_s3, 26  ;;  %s1540_s7 = sshll.u32 %s346_s16, 4 }
  0x9a   : > { %s1539_s14 = sadd.s32 134217728, %s1538_s8  ;;  %s1628_s25 = sshll.u32 %s2266_s10, 8 }
  0x9b   : > { %1730 = dma.general (%p2957_p10), %s308_s15, 1024, %s322_s19, %s296_s17, %s2298_s21, [#allocation17], %s1539_s14, 0  }
  0x9c   : > { %s2612_s30 = scalar_lea.hbm %s2893_s1, %s1628_s25  ;;  %s348_s22 = scalar_lea.vmem [#allocation7], %s1540_s7 }
  0x9d   : > { %s355_s18 = sshll.u32 %s348_s22, 4  ;;  %s2616_s19 = scalar_lea.sflag [#allocation8], %s344_s24  ;;  %s2614_s18 = int_to_ptr.vmem [resolvable:$true] %s355_s18 }
  0x9e   : > { %s2092_s3 = scalar_lea.hbm %s2612_s30, 256  ;;  %p2958_p3 = scmp.ne.s32.totalorder %s2938_s23, 0 }
  0x9f   : > { %p2093_p9 = scmp.ne.s32.totalorder %s2612_s30, %s2092_s3  ;;  %s2096_s8 = scalar_lea.hbm %s2893_s1, 512 }
  0xa0   : > { %p2097_p2 = scmp.lt.u32.totalorder %s2612_s30, %s2893_s1  ;;  %p2098_p11 = scmp.lt.u32.totalorder %s2096_s8, %s2092_s3 }
  0xa1   : > { %p2094_p7 = pnand %p2093_p9, %p2958_p3  ;;  %p2100_p5 = scmp.lt.u32.totalorder %s2092_s3, %s2612_s30 }
  0xa2   : > { %p2099_p1 = por %p2098_p11, %p2097_p2 }
  0xa3   : > { %p2095_p12 = pneg %p2094_p7 }
  0xa4   : > { %p2101_p13 = por %p2100_p5, %p2099_p1 }
  0xa6   : > { %p2102_p4 = pnand %p2101_p13, %p2095_p12 }
  0xa8   : > { %2105 = shalt.err (!%p2102_p4)
}
  0xa9   : > { %s2106_s21 = scalar_lea.vmem %s2614_s18, 256  ;;  %s2299_s24 = smov [#allocation7]  }
  0xaa   : > { %p2107_p8 = scmp.ne.s32.totalorder %s2614_s18, %s2106_s21  ;;  %s2110_s16 = sshll.u32 %s2299_s24, 4  ;;  %s2111_s16 = int_to_ptr.vmem [resolvable:$false] %s2110_s16 }
  0xab   : > { %s2112_s7 = scalar_lea.vmem %s2111_s16, 512  ;;  %p2113_p10 = scmp.lt.s32.totalorder %s2614_s18, %s2111_s16 }
  0xac   : > { %p2108_p0 = pnand %p2107_p8, %p2958_p3  ;;  %p2114_p9 = scmp.lt.s32.totalorder %s2112_s7, %s2106_s21 }
  0xae   : > { %p2109_p6 = pneg %p2108_p0  ;;  %p2115_p7 = por %p2114_p9, %p2113_p10 }
  0xb0   : > { %p2116_p2 = pnand %p2115_p7, %p2109_p6 }
  0xb2   : > { %2119 = shalt.err (!%p2116_p2)
}
  0xb3   : > { %s2300_s25 = smov 128   ;;  %s2301_s27 = smov 8  }
  0xb4   : > { %1731 = dma.hbm_to_vmem [thread:$0]  (%p2958_p3), %s2612_s30, 256, %s2614_s18, %s2616_s19, %s2300_s25, %s2300_s25, %s2301_s27  }
  0xb5 PF: > { %p2959_p12 = scmp.ne.s32.totalorder %s2952_s13, 0 }
  0xb6   : > { %s2643_s4 = sand.u32 (!%p2959_p12), 1, %s2246_s28   ;;  %p2960_p11 = scmp.ne.s32.totalorder (!%p2959_p12), %s2937_s20, 0 }
  0xb7   : > { %367 = sbr.rel (%p2959_p12) target bundleno = 1090 (0x442), region = 44  ;;  %s1544_s22 = sshll.u32 (!%p2959_p12), %s2643_s4, 6 }
  0xb8   : > { %s370_s3 = scalar_lea.sflag (!%p2959_p12), [#allocation5], %s2643_s4  ;;  %s2647_s15 = scalar_lea.vmem (!%p2959_p12), [#allocation4], %s1544_s22 }
  0xbe   : > { %2205 = dma.done.wait (%p2960_p11), %s370_s3, 1024  }
  0xbf   : > { %2207 = vsyncadd (%p2960_p11), %s370_s3, 4294966272  ;;  %s2961_s23 = sld [smem:[#allocation28_spill]]  ;;  %s2962_s13 = sld [smem:[#allocation36_spill]] }
  0xc0   : > { %s378_s30 = sand.u32 1, %s2412_s12  }
  0xc1   : > { %s379_s6 = scalar_lea.sflag [#allocation8], %s378_s30 }
  0xc5   : > { %s380_s18 = sand.u32 1, %s2961_s23   ;;  %p2963_p3 = scmp.ne.s32.totalorder %s2962_s13, 0 }
  0xc6   : > { %s1545_s19 = sshll.u32 %s380_s18, 4 }
  0xc7   : > { %s382_s8 = scalar_lea.vmem [#allocation7], %s1545_s19 }
  0xc8   : > { %2209 = dma.done.wait (%p2963_p3), %s379_s6, 256  }
  0xc9   : > { %2211 = vsyncadd (%p2963_p3), %s379_s6, 4294967040  ;;  %p2964_p1 = scmp.eq.s32.totalorder %s2412_s12, 0 }
  0xcb   : > { %2213 = dma.done.wait (%p2964_p1), [#allocation8], 3072   ;;  %p2965_p5 = pmov %p2964_p1 }
  0xcc   : > { %p2966_p13 = pmov %p2964_p1 }
  0xcd   : > { %2215 = vsyncadd (%p2965_p5), [#allocation8], 4294964224 }
  0xce   : > { %2217 = dma.done.wait (%p2966_p13), [#allocation11], 3072   ;;  %p2967_p4 = pmov %p2964_p1 }
  0xcf   : > { %s2669_s20 = scalar_lea.vmem [#allocation13], %s1544_s22  ;;  %s2671_s14 = scalar_lea.vmem [#allocation14], %s1545_s19 }
  0xd0   : > { %2219 = vsyncadd (%p2967_p4), [#allocation11], 4294964224  ;;  %s2968_s17 = sld [smem:[#allocation30_spill]] }
  0xd6   : > { %p1551_p8 = scmp.ne.s32.totalorder %s2968_s17, 0 }
  0xd7   : > { %v446_v0 = vld [vmem:[%s382_s8] sm:$0xff] (!%p1551_p8)  ;;  %v447_v1 = vld [vmem:[%s382_s8 + $0x8] sm:$0xff] (!%p1551_p8) }
  0xd8   : > { %445 = sbr.rel (%p1551_p8) target bundleno = 223 (0xdf), region = 68  ;;  %448 = vst [vmem:[#allocation2] sm:$0xff] (!%p1551_p8), %v446_v0  ;;  %449 = vst [vmem:[#allocation2 + $0x8] sm:$0xff] (!%p1551_p8), %v447_v1 }
  0xdf PF: > { %v1916_v2 = vld [vmem:[#allocation9 + $0x4] ss:$12 sps:$4 sm:$0xff]   ;;  %v1918_v3 = vld [vmem:[#allocation9] ss:$12 sps:$4 sm:$0xff]   ;;  %v2302_v4 = vmov 0   ;;  %v1950_v30 = vld [vmem:[%s2647_s15 + $0x18] sm:$0xff]   ;;  %v500_v37 = vlaneseq }
  0xe0   : > { %723 = vmatprep.mubr.bf16.mxu0 %v2302_v4  ;;  %691 = vmatprep.subr.bf16.mxu0 %v1916_v2  ;;  %v1919_v5 = vld [vmem:[#allocation9 + $0x1c] ss:$12 sps:$4 sm:$0xff]   ;;  %v1921_v6 = vld [vmem:[#allocation9 + $0x18] ss:$12 sps:$4 sm:$0xff]   ;;  %v1922_v7 = vld [vmem:[#allocation9 + $0x34] ss:$12 sps:$4 sm:$0xff]  }
  0xe1   : > { %692 = vmatpush1.bf16.msra.mxu0 %v1918_v3  ;;  %v1924_v8 = vld [vmem:[#allocation9 + $0x30] ss:$12 sps:$4 sm:$0xff]   ;;  %v1925_v9 = vld [vmem:[#allocation9 + $0x4c] ss:$12 sps:$4 sm:$0xff]   ;;  %v1927_v10 = vld [vmem:[#allocation9 + $0x48] ss:$12 sps:$4 sm:$0xff]  }
  0xe2   : > { %693 = vmatprep.subr.bf16.mxu0 %v1919_v5  ;;  %v1928_v11 = vld [vmem:[#allocation9 + $0x64] ss:$12 sps:$4 sm:$0xff]   ;;  %v1940_v12 = vld [vmem:[#allocation9 + $0x8] ss:$12 sps:$4 sm:$0xff]   ;;  %v1942_v14 = vld [vmem:[#allocation9 + $0x20] ss:$12 sps:$4 sm:$0xff]  }
  0xe3   : > { %v1941_v13 = vld [vmem:[%s2647_s15] sm:$0xff]   ;;  %1665 = vmatprep.subr.bf16.mxu1 %v1940_v12  ;;  %v1931_v17 = vld [vmem:[#allocation9 + $0x7c] ss:$12 sps:$4 sm:$0xff]   ;;  %v1937_v23 = vld [vmem:[#allocation9 + $0xac] ss:$12 sps:$4 sm:$0xff]   ;;  %v501_v38 = vshrl.u32 %v500_v37, 7 }
  0xe4   : > { %v1930_v15 = vld [vmem:[#allocation9 + $0x60] ss:$12 sps:$4 sm:$0xff]   ;;  %1666 = vmatpush3.bf16.msra.mxu1 %v1940_v12  ;;  %1681 = vmatprep.mubr.bf16.mxu1 %v1941_v13  ;;  %v1943_v16 = vld [vmem:[#allocation9 + $0x38] ss:$12 sps:$4 sm:$0xff]   ;;  %v1945_v19 = vld [vmem:[#allocation9 + $0x50] ss:$12 sps:$4 sm:$0xff]  }
  0xe5   : > { %694 = vmatpush1.bf16.msra.mxu0 %v1921_v6  ;;  %1667 = vmatprep.subr.bf16.mxu1 %v1942_v14  ;;  %v1933_v18 = vld [vmem:[#allocation9 + $0x78] ss:$12 sps:$4 sm:$0xff]   ;;  %v1934_v20 = vld [vmem:[#allocation9 + $0x94] ss:$12 sps:$4 sm:$0xff]   ;;  %v1936_v21 = vld [vmem:[#allocation9 + $0x90] ss:$12 sps:$4 sm:$0xff]  }
  0xe6   : > { %695 = vmatprep.subr.bf16.mxu0 %v1922_v7  ;;  %v1946_v22 = vld [vmem:[#allocation9 + $0x68] ss:$12 sps:$4 sm:$0xff]   ;;  %v1948_v25 = vld [vmem:[#allocation9 + $0x80] ss:$12 sps:$4 sm:$0xff]   ;;  %v1949_v26 = vld [vmem:[#allocation9 + $0x98] ss:$12 sps:$4 sm:$0xff]  }
  0xe7   : > { %v1939_v24 = vld [vmem:[#allocation9 + $0xa8] ss:$12 sps:$4 sm:$0xff]   ;;  %v1951_v27 = vld [vmem:[#allocation9 + $0xb0] ss:$12 sps:$4 sm:$0xff]   ;;  %v1952_v31 = vld [vmem:[%s2647_s15 + $0x20] sm:$0xff]   ;;  %v502_v39 = vsub.s32 0, %v501_v38 }
  0xe8   : > { %1668 = vmatpush3.bf16.msra.mxu1 %v1942_v14  ;;  %v1944_v28 = vld [vmem:[%s2647_s15 + $0x8] sm:$0xff]   ;;  %v1947_v29 = vld [vmem:[%s2647_s15 + $0x10] sm:$0xff]   ;;  %v1955_v34 = vld [vmem:[%s2647_s15 + $0x38] sm:$0xff]   ;;  %s2969_s24 = sld [smem:[#allocation41_spill]]  ;;  %v506_v41 = vsub.s32 1, %v501_v38  ;;  %v510_v52 = vsub.s32 2, %v501_v38 }
  0xe9   : > { %696 = vmatpush1.bf16.msra.mxu0 %v1924_v8  ;;  %1669 = vmatprep.subr.bf16.mxu1 %v1943_v16  ;;  %v1953_v32 = vld [vmem:[%s2647_s15 + $0x28] sm:$0xff]   ;;  %v1954_v33 = vld [vmem:[%s2647_s15 + $0x30] sm:$0xff]   ;;  %v2692_v36 = vld [vmem:[#allocation2 + $0x8] sm:$0xff]   ;;  %s2757_s16 = smov 0  }
  0xea   : > { %697 = vmatprep.subr.bf16.mxu0 %v1925_v9  ;;  %v2690_v35 = vld [vmem:[#allocation2] sm:$0xff]  }
  0xec   : > { %1670 = vmatpush3.bf16.msra.mxu1 %v1943_v16 }
  0xed   : > { %698 = vmatpush1.bf16.msra.mxu0 %v1927_v10  ;;  %1671 = vmatprep.subr.bf16.mxu1 %v1945_v19 }
  0xee   : > { %699 = vmatprep.subr.bf16.mxu0 %v1928_v11  ;;  %v498_v40 = vld [vmem:[%s2969_s24] sm:$0x7] }
  0xef   : > { %v2697_v42 = vrot.slane %v498_v40, %v502_v39  ;;  %v2699_v43 = vrot.slane %v498_v40, %v506_v41  ;;  %v2705_v54 = vrot.slane %v498_v40, %v510_v52 }
  0xf0   : > { %1672 = vmatpush3.bf16.msra.mxu1 %v1945_v19 }
  0xf1   : > { %700 = vmatpush1.bf16.msra.mxu0 %v1930_v15  ;;  %1673 = vmatprep.subr.bf16.mxu1 %v1946_v22 }
  0xf2   : > { %701 = vmatprep.subr.bf16.mxu0 %v1931_v17 }
  0xf4   : > { %1674 = vmatpush3.bf16.msra.mxu1 %v1946_v22 }
  0xf5   : > { %702 = vmatpush1.bf16.msra.mxu0 %v1933_v18  ;;  %1675 = vmatprep.subr.bf16.mxu1 %v1948_v25 }
  0xf6   : > { %703 = vmatprep.subr.bf16.mxu0 %v1934_v20 }
  0xf8   : > { %1676 = vmatpush3.bf16.msra.mxu1 %v1948_v25 }
  0xf9   : > { %704 = vmatpush1.bf16.msra.mxu0 %v1936_v21  ;;  %1677 = vmatprep.subr.bf16.mxu1 %v1949_v26 }
  0xfa   : > { %705 = vmatprep.subr.bf16.mxu0 %v1937_v23 }
  0xfc   : > { %1678 = vmatpush3.bf16.msra.mxu1 %v1949_v26 }
  0xfd   : > { %706 = vmatpush1.bf16.msra.mxu0 %v1939_v24  ;;  %1679 = vmatprep.subr.bf16.mxu1 %v1951_v27 }
 0x100   : > { %724 = vmatmul.mubr.bf16.vlgmr.msra.gmra.mrb[0].mxu0 %v1941_v13  ;;  %1680 = vmatpush3.bf16.msra.mxu1 %v1951_v27 }
 0x101   : > { %733 = vmatprep.mubr.bf16.mxu0 %v2302_v4 }
 0x103   : > { %1682 = vmatmul.mubr.bf16.vlgmr.msra.gmra.mrb[0].mxu1 %v1944_v28 }
 0x104   : > { %1685 = vmatprep.mubr.bf16.mxu1 %v1947_v29 }
 0x108   : > { %734 = vmatmul.mubr.bf16.gmra.mrb[4].mxu0 %v1944_v28 }
 0x109   : > { %743 = vmatprep.mubr.bf16.mxu0 %v2302_v4 }
 0x10b   : > { %1686 = vmatmul.mubr.bf16.gmra.mrb[4].mxu1 %v1950_v30 }
 0x10c   : > { %1689 = vmatprep.mubr.bf16.mxu1 %v1952_v31 }
 0x110   : > { %744 = vmatmul.mubr.bf16.gmra.mrb[8].mxu0 %v1947_v29 }
 0x111   : > { %753 = vmatprep.mubr.bf16.mxu0 %v2302_v4 }
 0x113   : > { %1690 = vmatmul.mubr.bf16.gmra.mrb[8].mxu1 %v1953_v32 }
 0x114   : > { %1693 = vmatprep.mubr.bf16.mxu1 %v1954_v33 }
 0x118   : > { %754 = vmatmul.mubr.bf16.gmra.mrb[12].mxu0 %v1950_v30 }
 0x119   : > { %763 = vmatprep.mubr.bf16.mxu0 %v2302_v4 }
 0x11b   : > { %1694 = vmatmul.mubr.bf16.gmra.mrb[12].mxu1 %v1955_v34 }
 0x120   : > { %764 = vmatmul.mubr.bf16.gmra.mrb[16].mxu0 %v1952_v31 }
 0x121   : > { %773 = vmatprep.mubr.bf16.mxu0 %v2302_v4 }
 0x128   : > { %774 = vmatmul.mubr.bf16.gmra.mrb[20].mxu0 %v1953_v32 }
 0x129   : > { %783 = vmatprep.mubr.bf16.mxu0 %v2302_v4 }
 0x130   : > { %784 = vmatmul.mubr.bf16.gmra.mrb[24].mxu0 %v1954_v33 }
 0x131   : > { %793 = vmatprep.mubr.bf16.mxu0 %v2302_v4 }
 0x138   : > { %794 = vmatmul.mubr.bf16.gmra.mrb[28].mxu0 %v1955_v34 }
 0x1d3   : > { %v725_v44 = vpop.f32.mrb[0].mxu0 }
 0x1d4   : > { %v726_v45 = vadd.f32 %v725_v44, %v2697_v42  ;;  %v727_v46 = vpop.f32.mrb[1].mxu0 }
 0x1d5   : > { %v728_v47 = vadd.f32 %v727_v46, %v2699_v43  ;;  %v729_v48 = vpop.f32.mrb[2].mxu0 }
 0x1d6   : > { %901 = vst [vmem:[#allocation3] sm:$0xff] %v726_v45  ;;  %v730_v49 = vadd.f32 %v729_v48, %v2697_v42  ;;  %v731_v50 = vpop.f32.mrb[3].mxu0  ;;  %v1683_v61 = vpop.f32.mrb[0].mxu1 }
 0x1d7   : > { %902 = vst [vmem:[#allocation3 + $0x8] sm:$0xff] %v728_v47  ;;  %v732_v51 = vadd.f32 %v731_v50, %v2699_v43  ;;  %v847_v63 = vadd.f32 %v1683_v61, %v2705_v54  ;;  %v838_v0 = vpop.f32.mrb[1].mxu1 }
 0x1d8   : > { %904 = vst [vmem:[#allocation3 + $0x18] sm:$0xff] %v730_v49  ;;  %v839_v1 = vadd.f32 %v838_v0, %v2705_v54  ;;  %v1684_v2 = vpop.f32.mrb[2].mxu1 }
 0x1d9   : > { %905 = vst [vmem:[#allocation3 + $0x20] sm:$0xff] %v732_v51  ;;  %909 = vst [vmem:[#allocation3 + $0x40] sm:$0xff] %v847_v63  ;;  %v850_v3 = vadd.f32 %v1684_v2, %v2705_v54  ;;  %v841_v4 = vpop.f32.mrb[3].mxu1 }
 0x1da   : > { %903 = vst [vmem:[#allocation3 + $0x10] sm:$0xff] %v839_v1  ;;  %v842_v5 = vadd.f32 %v841_v4, %v2705_v54 }
 0x1db   : > { %v735_v53 = vpop.f32.mrb[4].mxu0  ;;  %912 = vst [vmem:[#allocation3 + $0x58] sm:$0xff] %v850_v3 }
 0x1dc   : > { %v736_v55 = vadd.f32 %v735_v53, %v2697_v42  ;;  %v737_v56 = vpop.f32.mrb[5].mxu0  ;;  %906 = vst [vmem:[#allocation3 + $0x28] sm:$0xff] %v842_v5 }
 0x1dd   : > { %v738_v57 = vadd.f32 %v737_v56, %v2699_v43  ;;  %v739_v58 = vpop.f32.mrb[6].mxu0 }
 0x1de   : > { %907 = vst [vmem:[#allocation3 + $0x30] sm:$0xff] %v736_v55  ;;  %v740_v59 = vadd.f32 %v739_v58, %v2697_v42  ;;  %v741_v60 = vpop.f32.mrb[7].mxu0  ;;  %v1687_v13 = vpop.f32.mrb[4].mxu1 }
 0x1df   : > { %908 = vst [vmem:[#allocation3 + $0x38] sm:$0xff] %v738_v57  ;;  %v742_v62 = vadd.f32 %v741_v60, %v2699_v43  ;;  %v863_v15 = vadd.f32 %v1687_v13, %v2705_v54  ;;  %v854_v16 = vpop.f32.mrb[5].mxu1 }
 0x1e0   : > { %910 = vst [vmem:[#allocation3 + $0x48] sm:$0xff] %v740_v59  ;;  %v855_v17 = vadd.f32 %v854_v16, %v2705_v54  ;;  %v1688_v18 = vpop.f32.mrb[6].mxu1 }
 0x1e1   : > { %911 = vst [vmem:[#allocation3 + $0x50] sm:$0xff] %v742_v62  ;;  %921 = vst [vmem:[#allocation3 + $0xa0] sm:$0xff] %v863_v15  ;;  %v866_v19 = vadd.f32 %v1688_v18, %v2705_v54  ;;  %v857_v20 = vpop.f32.mrb[7].mxu1 }
 0x1e2   : > { %915 = vst [vmem:[#allocation3 + $0x70] sm:$0xff] %v855_v17  ;;  %v858_v21 = vadd.f32 %v857_v20, %v2705_v54 }
 0x1e3   : > { %v745_v6 = vpop.f32.mrb[8].mxu0  ;;  %924 = vst [vmem:[#allocation3 + $0xb8] sm:$0xff] %v866_v19 }
 0x1e4   : > { %v746_v7 = vadd.f32 %v745_v6, %v2697_v42  ;;  %v747_v8 = vpop.f32.mrb[9].mxu0  ;;  %918 = vst [vmem:[#allocation3 + $0x88] sm:$0xff] %v858_v21 }
 0x1e5   : > { %v748_v9 = vadd.f32 %v747_v8, %v2699_v43  ;;  %v749_v10 = vpop.f32.mrb[10].mxu0 }
 0x1e6   : > { %913 = vst [vmem:[#allocation3 + $0x60] sm:$0xff] %v746_v7  ;;  %v750_v11 = vadd.f32 %v749_v10, %v2697_v42  ;;  %v751_v12 = vpop.f32.mrb[11].mxu0  ;;  %v1691_v29 = vpop.f32.mrb[8].mxu1 }
 0x1e7   : > { %914 = vst [vmem:[#allocation3 + $0x68] sm:$0xff] %v748_v9  ;;  %v752_v14 = vadd.f32 %v751_v12, %v2699_v43  ;;  %v879_v31 = vadd.f32 %v1691_v29, %v2705_v54  ;;  %v870_v32 = vpop.f32.mrb[9].mxu1 }
 0x1e8   : > { %916 = vst [vmem:[#allocation3 + $0x78] sm:$0xff] %v750_v11  ;;  %v871_v33 = vadd.f32 %v870_v32, %v2705_v54  ;;  %v1692_v34 = vpop.f32.mrb[10].mxu1 }
 0x1e9   : > { %917 = vst [vmem:[#allocation3 + $0x80] sm:$0xff] %v752_v14  ;;  %933 = vst [vmem:[#allocation3 + $0x100] sm:$0xff] %v879_v31  ;;  %v882_v37 = vadd.f32 %v1692_v34, %v2705_v54  ;;  %v873_v38 = vpop.f32.mrb[11].mxu1 }
 0x1ea   : > { %927 = vst [vmem:[#allocation3 + $0xd0] sm:$0xff] %v871_v33  ;;  %v874_v39 = vadd.f32 %v873_v38, %v2705_v54 }
 0x1eb   : > { %v755_v22 = vpop.f32.mrb[12].mxu0  ;;  %936 = vst [vmem:[#allocation3 + $0x118] sm:$0xff] %v882_v37 }
 0x1ec   : > { %v756_v23 = vadd.f32 %v755_v22, %v2697_v42  ;;  %v757_v24 = vpop.f32.mrb[13].mxu0  ;;  %930 = vst [vmem:[#allocation3 + $0xe8] sm:$0xff] %v874_v39 }
 0x1ed   : > { %v758_v25 = vadd.f32 %v757_v24, %v2699_v43  ;;  %v759_v26 = vpop.f32.mrb[14].mxu0 }
 0x1ee   : > { %919 = vst [vmem:[#allocation3 + $0x90] sm:$0xff] %v756_v23  ;;  %v760_v27 = vadd.f32 %v759_v26, %v2697_v42  ;;  %v761_v28 = vpop.f32.mrb[15].mxu0  ;;  %v1695_v49 = vpop.f32.mrb[12].mxu1 }
 0x1ef   : > { %920 = vst [vmem:[#allocation3 + $0x98] sm:$0xff] %v758_v25  ;;  %v762_v30 = vadd.f32 %v761_v28, %v2699_v43  ;;  %v895_v51 = vadd.f32 %v1695_v49, %v2705_v54  ;;  %v886_v52 = vpop.f32.mrb[13].mxu1 }
 0x1f0   : > { %922 = vst [vmem:[#allocation3 + $0xa8] sm:$0xff] %v760_v27  ;;  %v887_v53 = vadd.f32 %v886_v52, %v2705_v54  ;;  %v1696_v55 = vpop.f32.mrb[14].mxu1 }
 0x1f1   : > { %923 = vst [vmem:[#allocation3 + $0xb0] sm:$0xff] %v762_v30  ;;  %945 = vst [vmem:[#allocation3 + $0x160] sm:$0xff] %v895_v51  ;;  %v898_v56 = vadd.f32 %v1696_v55, %v2705_v54  ;;  %v889_v57 = vpop.f32.mrb[15].mxu1 }
 0x1f2   : > { %939 = vst [vmem:[#allocation3 + $0x130] sm:$0xff] %v887_v53  ;;  %v890_v58 = vadd.f32 %v889_v57, %v2705_v54 }
 0x1f3   : > { %v765_v40 = vpop.f32.mrb[16].mxu0  ;;  %948 = vst [vmem:[#allocation3 + $0x178] sm:$0xff] %v898_v56 }
 0x1f4   : > { %v766_v41 = vadd.f32 %v765_v40, %v2697_v42  ;;  %v767_v44 = vpop.f32.mrb[17].mxu0  ;;  %942 = vst [vmem:[#allocation3 + $0x148] sm:$0xff] %v890_v58 }
 0x1f5   : > { %v768_v45 = vadd.f32 %v767_v44, %v2699_v43  ;;  %v769_v46 = vpop.f32.mrb[18].mxu0 }
 0x1f6   : > { %925 = vst [vmem:[#allocation3 + $0xc0] sm:$0xff] %v766_v41  ;;  %v770_v47 = vadd.f32 %v769_v46, %v2697_v42  ;;  %v771_v48 = vpop.f32.mrb[19].mxu0 }
 0x1f7   : > { %926 = vst [vmem:[#allocation3 + $0xc8] sm:$0xff] %v768_v45  ;;  %v772_v50 = vadd.f32 %v771_v48, %v2699_v43 }
 0x1f8   : > { %928 = vst [vmem:[#allocation3 + $0xd8] sm:$0xff] %v770_v47 }
 0x1f9   : > { %929 = vst [vmem:[#allocation3 + $0xe0] sm:$0xff] %v772_v50 }
 0x1fb   : > { %v775_v59 = vpop.f32.mrb[20].mxu0 }
 0x1fc   : > { %v776_v60 = vadd.f32 %v775_v59, %v2697_v42  ;;  %v777_v61 = vpop.f32.mrb[21].mxu0 }
 0x1fd   : > { %v778_v62 = vadd.f32 %v777_v61, %v2699_v43  ;;  %v779_v63 = vpop.f32.mrb[22].mxu0 }
 0x1fe   : > { %931 = vst [vmem:[#allocation3 + $0xf0] sm:$0xff] %v776_v60  ;;  %v780_v0 = vadd.f32 %v779_v63, %v2697_v42  ;;  %v781_v1 = vpop.f32.mrb[23].mxu0 }
 0x1ff   : > { %932 = vst [vmem:[#allocation3 + $0xf8] sm:$0xff] %v778_v62  ;;  %v782_v2 = vadd.f32 %v781_v1, %v2699_v43 }
 0x200   : > { %934 = vst [vmem:[#allocation3 + $0x108] sm:$0xff] %v780_v0 }
 0x201   : > { %935 = vst [vmem:[#allocation3 + $0x110] sm:$0xff] %v782_v2 }
 0x203   : > { %v785_v3 = vpop.f32.mrb[24].mxu0 }
 0x204   : > { %v786_v54 = vadd.f32 %v785_v3, %v2697_v42  ;;  %v787_v4 = vpop.f32.mrb[25].mxu0 }
 0x205   : > { %v788_v5 = vadd.f32 %v787_v4, %v2699_v43  ;;  %v789_v6 = vpop.f32.mrb[26].mxu0 }
 0x206   : > { %937 = vst [vmem:[#allocation3 + $0x120] sm:$0xff] %v786_v54  ;;  %v790_v7 = vadd.f32 %v789_v6, %v2697_v42  ;;  %v791_v8 = vpop.f32.mrb[27].mxu0 }
 0x207   : > { %938 = vst [vmem:[#allocation3 + $0x128] sm:$0xff] %v788_v5  ;;  %v792_v9 = vadd.f32 %v791_v8, %v2699_v43 }
 0x208   : > { %940 = vst [vmem:[#allocation3 + $0x138] sm:$0xff] %v790_v7 }
 0x209   : > { %941 = vst [vmem:[#allocation3 + $0x140] sm:$0xff] %v792_v9 }
 0x20b   : > { %v795_v10 = vpop.f32.mrb[28].mxu0 }
 0x20c   : > { %v796_v11 = vadd.f32 %v795_v10, %v2697_v42  ;;  %v797_v12 = vpop.f32.mrb[29].mxu0 }
 0x20d   : > { %v798_v13 = vadd.f32 %v797_v12, %v2699_v43  ;;  %v799_v14 = vpop.f32.mrb[30].mxu0 }
 0x20e   : > { %943 = vst [vmem:[#allocation3 + $0x150] sm:$0xff] %v796_v11  ;;  %v800_v15 = vadd.f32 %v799_v14, %v2697_v42  ;;  %v801_v16 = vpop.f32.mrb[31].mxu0 }
 0x20f   : > { %944 = vst [vmem:[#allocation3 + $0x158] sm:$0xff] %v798_v13  ;;  %v802_v17 = vadd.f32 %v801_v16, %v2699_v43 }
 0x210   : > { %946 = vst [vmem:[#allocation3 + $0x168] sm:$0xff] %v800_v15 }
 0x211   : > { %947 = vst [vmem:[#allocation3 + $0x170] sm:$0xff] %v802_v17 }
 0x212 LB: >> { %v1956_v42 = vld [vmem:[#allocation10 + $0x4] ss:$8 sps:$4 sm:$0xff]   ;;  %v1958_v43 = vld [vmem:[#allocation10] ss:$8 sps:$4 sm:$0xff]   ;;  %v2303_v18 = vmov 0   ;;  %v968_v33 = vpack.c.bf16 %v2274_v36, %v2278_v35  ;;  %v2304_v37 = vmov 0.0   ;;  %s2282_s16 = sphi %s2757_s16, %s956_s16   ;;  %v2278_v35 = vphi %v2690_v35, %v2971_v35   ;;  %v2274_v36 = vphi %v2692_v36, %v2970_v36  }
 0x213   : >> { %1097 = vmatprep.mubr.bf16.mxu0 %v2303_v18  ;;  %1065 = vmatprep.subr.bf16.mxu0 %v1956_v42  ;;  %v1959_v19 = vld [vmem:[#allocation10 + $0x14] ss:$8 sps:$4 sm:$0xff]   ;;  %v1961_v20 = vld [vmem:[#allocation10 + $0x10] ss:$8 sps:$4 sm:$0xff]   ;;  %v1962_v21 = vld [vmem:[#allocation10 + $0x24] ss:$8 sps:$4 sm:$0xff]  }
 0x214   : >> { %1066 = vmatpush1.bf16.msra.mxu0 %v1958_v43  ;;  %v1964_v22 = vld [vmem:[#allocation10 + $0x20] ss:$8 sps:$4 sm:$0xff]   ;;  %v1965_v23 = vld [vmem:[#allocation10 + $0x34] ss:$8 sps:$4 sm:$0xff]   ;;  %v1967_v24 = vld [vmem:[#allocation10 + $0x30] ss:$8 sps:$4 sm:$0xff]   ;;  %1697 = vmatprep.subr.bf16.mxu1 %v2304_v37 }
 0x215   : >> { %1067 = vmatprep.subr.bf16.mxu0 %v1959_v19  ;;  %v1968_v25 = vld [vmem:[#allocation10 + $0x44] ss:$8 sps:$4 sm:$0xff]   ;;  %v1970_v26 = vld [vmem:[#allocation10 + $0x40] ss:$8 sps:$4 sm:$0xff]   ;;  %v1971_v27 = vld [vmem:[#allocation10 + $0x54] ss:$8 sps:$4 sm:$0xff]  }
 0x216   : >> { %v1973_v28 = vld [vmem:[#allocation10 + $0x50] ss:$8 sps:$4 sm:$0xff]   ;;  %v1974_v29 = vld [vmem:[#allocation10 + $0x64] ss:$8 sps:$4 sm:$0xff]   ;;  %v1976_v30 = vld [vmem:[#allocation10 + $0x60] ss:$8 sps:$4 sm:$0xff]  }
 0x217   : >> { %v1977_v31 = vld [vmem:[#allocation10 + $0x74] ss:$8 sps:$4 sm:$0xff]   ;;  %v1979_v32 = vld [vmem:[#allocation10 + $0x70] ss:$8 sps:$4 sm:$0xff]   ;;  %v1980_v34 = vld [vmem:[#allocation12] sm:$0xff]   ;;  %vm2305_vm0 = vmmov 0  }
 0x218   : >> { %1068 = vmatpush1.bf16.msra.mxu0 %v1961_v20  ;;  %1698 = vmatpush3.bf16.msra.mxu1 %v1980_v34  ;;  %v1981_v38 = vld [vmem:[#allocation12 + $0x8] sm:$0xff]   ;;  %v1982_v39 = vld [vmem:[#allocation12 + $0x10] sm:$0xff]   ;;  %v1983_v40 = vld [vmem:[#allocation12 + $0x18] sm:$0xff]   ;;  %s1629_s7 = smul.u32 48, %s2282_s16  ;;  %s1632_s27 = sshll.u32 %s2282_s16, 3 }
 0x219   : >> { %1069 = vmatprep.subr.bf16.mxu0 %v1962_v21  ;;  %1699 = vmatprep.subr.bf16.mxu1 %v2304_v37  ;;  %v1984_v41 = vld [vmem:[#allocation12 + $0x20] sm:$0xff]   ;;  %v1985_v44 = vld [vmem:[#allocation12 + $0x28] sm:$0xff]   ;;  %v1986_v45 = vld [vmem:[#allocation12 + $0x30] sm:$0xff]   ;;  %s1264_s22 = scalar_lea.vmem %s2669_s20, %s1632_s27 [#allocation13]  ;;  %s956_s16 = sadd.s32 1, %s2282_s16  }
 0x21a   : >> { %1713 = vmatprep.mubr.msk.bf16.mxu1 %vm2305_vm0, %v2304_v37  ;;  %v1987_v46 = vld [vmem:[#allocation12 + $0x38] sm:$0xff]   ;;  %s2771_s25 = scalar_lea.vmem [#allocation3], %s1629_s7  ;;  %p953_p0 = scmp.ge.s32.totalorder %s956_s16, 8  }
 0x21b   : >> { %v962_v47 = vld [vmem:[%s2771_s25] sm:$0xff]  ;;  %v965_v49 = vld [vmem:[%s2771_s25 + $0x18] sm:$0xff]  ;;  %v963_v3 = vld [vmem:[%s2771_s25 + $0x8] sm:$0xff]  ;;  %s1272_s15 = scalar_lea.sflag (%p953_p0), [#allocation6], %s2643_s4  ;;  %s2799_s23 = scalar_lea.sflag (%p953_p0), [#allocation15], %s380_s18 }
 0x21c   : >> { %1070 = vmatpush1.bf16.msra.mxu0 %v1964_v22  ;;  %1700 = vmatpush3.bf16.msra.mxu1 %v1981_v38  ;;  %v966_v4 = vld [vmem:[%s2771_s25 + $0x20] sm:$0xff]  ;;  %v964_v9 = vld [vmem:[%s2771_s25 + $0x10] sm:$0xff]  ;;  %v967_v13 = vld [vmem:[%s2771_s25 + $0x28] sm:$0xff] }
 0x21d   : >> { %1071 = vmatprep.subr.bf16.mxu0 %v1965_v23  ;;  %1701 = vmatprep.subr.bf16.mxu1 %v2304_v37 }
 0x220   : >> { %1072 = vmatpush1.bf16.msra.mxu0 %v1967_v24  ;;  %1702 = vmatpush3.bf16.msra.mxu1 %v1982_v39 }
 0x221   : >> { %1073 = vmatprep.subr.bf16.mxu0 %v1968_v25  ;;  %1703 = vmatprep.subr.bf16.mxu1 %v2304_v37 }
 0x224   : >> { %1074 = vmatpush1.bf16.msra.mxu0 %v1970_v26  ;;  %1704 = vmatpush3.bf16.msra.mxu1 %v1983_v40 }
 0x225   : >> { %1075 = vmatprep.subr.bf16.mxu0 %v1971_v27  ;;  %1705 = vmatprep.subr.bf16.mxu1 %v2304_v37 }
 0x228   : >> { %1076 = vmatpush1.bf16.msra.mxu0 %v1973_v28  ;;  %1706 = vmatpush3.bf16.msra.mxu1 %v1984_v41 }
 0x229   : >> { %1077 = vmatprep.subr.bf16.mxu0 %v1974_v29  ;;  %1707 = vmatprep.subr.bf16.mxu1 %v2304_v37 }
 0x22c   : >> { %1078 = vmatpush1.bf16.msra.mxu0 %v1976_v30  ;;  %1708 = vmatpush3.bf16.msra.mxu1 %v1985_v44 }
 0x22d   : >> { %1079 = vmatprep.subr.bf16.mxu0 %v1977_v31  ;;  %1709 = vmatprep.subr.bf16.mxu1 %v2304_v37 }
 0x230   : >> { %1080 = vmatpush1.bf16.msra.mxu0 %v1979_v32  ;;  %1710 = vmatpush3.bf16.msra.mxu1 %v1986_v45 }
 0x231   : >> { %1711 = vmatprep.subr.bf16.mxu1 %v2304_v37 }
 0x233   : >> { %1098 = vmatmul.mubr.bf16.vlgmr.msra.gmra.mrb[0].mxu0 %v968_v33 }
 0x234   : >> { %1712 = vmatpush3.bf16.msra.mxu1 %v1987_v46 }
 0x306   : >> { %v1099_v48 = vpop.f32.mrb[0].mxu0 }
 0x307   : >> { %v1108_v50 = vadd.f32 %v1099_v48, %v962_v47  ;;  %v1101_v51 = vpop.f32.mrb[1].mxu0 }
 0x308   : >> { %v1103_v52 = vpop.f32.mrb[2].mxu0  ;;  %v1109_v54 = vadd.f32 %v1101_v51, %v963_v3 }
 0x309   : >> { %v1601_v53 = vmul.f32 -1.442695, %v1108_v50  ;;  %v1110_v55 = vadd.f32 %v1103_v52, %v965_v49  ;;  %v1105_v56 = vpop.f32.mrb[3].mxu0 }
 0x30a   : >> { %v1111_v5 = vadd.f32 %v1105_v56, %v966_v4  ;;  %v1602_v6 = vmul.f32 -1.442695, %v1109_v54 }
 0x30b   : >> { %1988 = vpow2.f32 %v1601_v53  ;;  %v1603_v57 = vmul.f32 -1.442695, %v1110_v55 }
 0x30c   : >> { %v1604_v7 = vmul.f32 -1.442695, %v1111_v5 }
 0x30d   : >> { %1990 = vpow2.f32 %v1603_v57 }
 0x315   : >> { %v1989_v58 = vpop.eup %1988 }
 0x316   : >> { %v1124_v59 = vadd.f32 1.0, %v1989_v58 }
 0x317   : >> { %v1991_v60 = vpop.eup %1990 }
 0x318   : >> { %1992 = vrcp.f32 %v1124_v59  ;;  %v1126_v61 = vadd.f32 1.0, %v1991_v60 }
 0x31a   : >> { %1994 = vrcp.f32 %v1126_v61 }
 0x31b   : >> { %1996 = vpow2.f32 %v1602_v6 }
 0x31c   : >> { %1998 = vpow2.f32 %v1604_v7 }
 0x322   : >> { %v1993_v62 = vpop.eup %1992 }
 0x323   : >> { %v1136_v0 = vmul.f32 %v2278_v35, %v1993_v62 }
 0x324   : >> { %v1995_v63 = vpop.eup %1994 }
 0x325   : >> { %v1137_v1 = vmul.f32 %v2274_v36, %v1995_v63  ;;  %v1997_v8 = vpop.eup %1996 }
 0x326   : >> { %v1999_v10 = vpop.eup %1998  ;;  %v1125_v11 = vadd.f32 1.0, %v1997_v8 }
 0x327   : >> { %v1138_v2 = vpack.c.bf16 %v1137_v1, %v1136_v0  ;;  %v1127_v17 = vadd.f32 1.0, %v1999_v10 }
 0x329   : >> { %1714 = vmatmul.mubr.bf16.vlgmr.msra.gmra.mrb[0].mxu1 %v1138_v2 }
 0x3fc   : >> { %v1237_v12 = vpop.f32.mrb[0].mxu1 }
 0x3fd   : >> { %v1244_v14 = vadd.f32 %v1237_v12, %v964_v9  ;;  %v1715_v15 = vpop.f32.mrb[1].mxu1 }
 0x3fe   : >> { %v1240_v16 = vpop.f32.mrb[2].mxu1 }
 0x3ff   : >> { %2000 = vtanh.f32 %v1244_v14  ;;  %v1245_v42 = vadd.f32 %v1240_v16, %v967_v13  ;;  %v1716_v43 = vpop.f32.mrb[3].mxu1 }
 0x400   : >> { %2002 = vrcp.f32 %v1125_v11 }
 0x401   : >> { %2004 = vtanh.f32 %v1245_v42 }
 0x402   : >> { %2006 = vrcp.f32 %v1127_v17 }
 0x409   : >> { %v2001_v18 = vpop.eup %2000 }
 0x40a   : >> { %v2003_v19 = vpop.eup %2002  ;;  %v1248_v20 = vsub.f32 %v2001_v18, %v2278_v35 }
 0x40b   : >> { %v2005_v21 = vpop.eup %2004 }
 0x40c   : >> { %v1250_v22 = vmul.f32 %v2003_v19, %v1248_v20  ;;  %v1249_v23 = vsub.f32 %v2005_v21, %v2274_v36  ;;  %v2007_v24 = vpop.eup %2006 }
 0x40e   : >> { %v1251_v25 = vmul.f32 %v2007_v24, %v1249_v23  ;;  %v1252_v26 = vadd.f32 %v2278_v35, %v1250_v22   ;;  %955 = sbr.rel (!%p953_p0) target bundleno = 530 (0x212), region = 154 }
 0x410   : >> { %v1253_v27 = vadd.f32 %v2274_v36, %v1251_v25   ;;  %v2971_v35 = vmov %v1252_v26  ;;  %1267 = vst [vmem:[#allocation2] sm:$0xff] (%p953_p0), %v1252_v26  ;;  %1269 = vst [vmem:[%s2671_s14] sm:$0xff] (%p953_p0), %v1252_v26 }
 0x412   : >> { %v1638_v28 = vpack.c.bf16 %v1253_v27, %v1252_v26  ;;  %v2970_v36 = vmov %v1253_v27  ;;  %1268 = vst [vmem:[#allocation2 + $0x8] sm:$0xff] (%p953_p0), %v1253_v27  ;;  %1270 = vst [vmem:[%s2671_s14 + $0x8] sm:$0xff] (%p953_p0), %v1253_v27 }
 0x414   : >> { %1639 = vst [vmem:[%s1264_s22] sm:$0xff] %v1638_v28  }
 0x415   : > { %s2973_s13 = sld [smem:[#allocation31_spill]]  ;;  %s2974_s30 = sld [smem:[#allocation30_spill]] }
 0x416   : > { %s2975_s19 = sld [smem:[#allocation37_spill]]  ;;  %s1309_s12 = sshll.u32 %s2669_s20, 4  ;;  %s1310_s12 = int_to_ptr.vmem [resolvable:$true] %s1309_s12 }
 0x417   : > { %s2976_s18 = sld [smem:[#allocation43_spill]]  ;;  %s2306_s7 = smov 128  }
 0x418   : > { %s2307_s25 = smov 256   ;;  %s2308_s27 = smov 2  }
 0x419   : > { %s2309_s22 = smov 64   ;;  %s2310_s20 = smov 4  }
 0x41a   : > { %s2311_s3 = smov [#allocation18]  }
 0x41b   : > { %s1620_s6 = sshll.u32 %s2973_s13, 1  ;;  %s1633_s8 = sshll.u32 %s2974_s30, 5 }
 0x41c   : > { %s1290_s17 = sadd.s32 %s1633_s8, %s1620_s6  ;;  %p2977_p6 = scmp.ne.s32.totalorder %s2975_s19, 0 }
 0x41d   : > { %s1622_s21 = sshll.u32 %s1290_s17, 6  ;;  %s2312_s30 = smov 0  }
 0x41e   : > { %s1292_s16 = scalar_lea.hbm %s2976_s18, %s1622_s21  ;;  %1740 = sst [smem:[#allocation19]] (%p2977_p6), %s2306_s7 }
 0x41f   : > { %1741 = sst [smem:[#allocation19 + $0x1]] (%p2977_p6), %s2307_s25  ;;  %s1634_s8 = sshll.u32 %s2973_s13, 8 }
 0x420   : > { %1742 = sst [smem:[#allocation19 + $0x2]] (%p2977_p6), %s2308_s27  ;;  %s1338_s17 = sshll.u32 %s2671_s14, 4  ;;  %s2828_s17 = int_to_ptr.vmem [resolvable:$true] %s1338_s17 }
 0x421   : > { %1743 = sst [smem:[#allocation19 + $0x3]] (%p2977_p6), %s2309_s22  ;;  %s2120_s25 = scalar_lea.vmem %s2828_s17, 256 }
 0x422   : > { %1744 = sst [smem:[#allocation19 + $0x4]] (%p2977_p6), %s2309_s22  ;;  %p2121_p10 = scmp.ne.s32.totalorder %s2828_s17, %s2120_s25 }
 0x423   : > { %1745 = sst [smem:[#allocation19 + $0x5]] (%p2977_p6), %s2310_s20 }
 0x424   : > { %1746 = dma.general (%p2977_p6), %s1310_s12, 1024, %s1292_s16, %s1272_s15, %s2311_s3, [#allocation19], %s2312_s30, 0  }
 0x425   : > { %s2978_s6 = sld [smem:[#allocation38_spill]]  ;;  %s2979_s24 = sld [smem:[#allocation44_spill]] }
 0x426   : > { %s2313_s15 = smov [#allocation14]  }
 0x427   : > { %s2124_s19 = sshll.u32 %s2313_s15, 4  ;;  %s2125_s19 = int_to_ptr.vmem [resolvable:$false] %s2124_s19 }
 0x428   : > { %s2126_s13 = scalar_lea.vmem %s2125_s19, 512  ;;  %p2127_p12 = scmp.lt.s32.totalorder %s2828_s17, %s2125_s19 }
 0x429   : > { %p2128_p11 = scmp.lt.s32.totalorder %s2126_s13, %s2120_s25 }
 0x42b   : > { %s2980_s18 = smov %s2979_s24  ;;  %s2826_s7 = scalar_lea.hbm %s2979_s24, %s1634_s8 }
 0x42c   : > { %p2981_p9 = scmp.ne.s32.totalorder %s2978_s6, 0  ;;  %p2129_p3 = por %p2128_p11, %p2127_p12 }
 0x42e   : > { %p2122_p7 = pnand %p2121_p10, %p2981_p9 }
 0x430   : > { %p2123_p2 = pneg %p2122_p7 }
 0x432   : > { %p2130_p1 = pnand %p2129_p3, %p2123_p2 }
 0x434   : > { %2133 = shalt.err (!%p2130_p1)
}
 0x435   : > { %s2134_s14 = scalar_lea.hbm %s2826_s7, 256  ;;  %s2138_s27 = scalar_lea.hbm %s2980_s18, 512 }
 0x436   : > { %p2135_p5 = scmp.ne.s32.totalorder %s2826_s7, %s2134_s14  ;;  %p2139_p8 = scmp.lt.u32.totalorder %s2826_s7, %s2980_s18 }
 0x437   : > { %p2140_p0 = scmp.lt.u32.totalorder %s2138_s27, %s2134_s14  ;;  %p2142_p10 = scmp.lt.u32.totalorder %s2134_s14, %s2826_s7 }
 0x438   : > { %p2136_p13 = pnand %p2135_p5, %p2981_p9 }
 0x439   : > { %p2141_p6 = por %p2140_p0, %p2139_p8 }
 0x43a   : > { %p2137_p4 = pneg %p2136_p13 }
 0x43b   : > { %p2143_p7 = por %p2142_p10, %p2141_p6 }
 0x43d   : > { %p2144_p2 = pnand %p2143_p7, %p2137_p4 }
 0x43f   : > { %2147 = shalt.err (!%p2144_p2)
}
 0x440   : > { %s2314_s3 = smov 128   ;;  %s2315_s30 = smov 8  }
 0x441   : > { %1747 = dma.vmem_to_hbm [thread:$0]  (%p2981_p9), %s2828_s17, 256, %s2826_s7, %s2799_s23, %s2314_s3, %s2314_s3, %s2315_s30  }
 0x442 PF: > { %s2982_s8 = sld [smem:[#allocation29_spill]]  ;;  %s2983_s21 = sld [smem:[#allocation39_spill]] }
 0x443   : > { %p1773_p12 = scmp.ge.s32.totalorder %s2270_s11, 2 }
 0x448   : > { %s1353_s4 = sand.u32 1, %s2982_s8   ;;  %p2984_p11 = scmp.ne.s32.totalorder %s2983_s21, 0 }
 0x449   : > { %s1354_s24 = scalar_lea.sflag [#allocation6], %s1353_s4 }
 0x44a   : > { %p1761_p3 = pnand %p1773_p12, %p2984_p11 }
 0x44c   : > { %2221 = dma.done.wait (!%p1761_p3), %s1354_s24, 1024  }
 0x44d   : > { %2223 = vsyncadd (!%p1761_p3), %s1354_s24, 4294966272  ;;  %s2985_s25 = sld [smem:[#allocation27_spill]] }
 0x44e   : > { %s2986_s15 = sld [smem:[#allocation40_spill]] }
 0x453   : > { %s1362_s19 = sand.u32 1, %s2985_s25  }
 0x454   : > { %p2987_p1 = scmp.ne.s32.totalorder %s2986_s15, 0  ;;  %s1363_s13 = scalar_lea.sflag [#allocation15], %s1362_s19 }
 0x456   : > { %p1764_p5 = pnand %p1773_p12, %p2987_p1 }
 0x458   : > { %2225 = dma.done.wait (!%p1764_p5), %s1363_s13, 256  }
 0x459   : > { %2227 = vsyncadd (!%p1764_p5), %s1363_s13, 4294967040  ;;  %s31_s11 = sadd.s32 1, %s2270_s11   ;;  %s2988_s24 = sld [smem:[#allocation28_spill]] }
 0x45a   : > { %p28_p9 = scmp.ge.s32.totalorder %s31_s11, 6   ;;  %s2989_s23 = sld [smem:[#allocation34_spill]] }
 0x45b   : > { %s2990_s6 = sld [smem:[#allocation35_spill]]  ;;  %s2991_s17 = sld [smem:[#allocation32_spill]] }
 0x45c   : > { %s2992_s7 = sld [smem:[#allocation33_spill]]  ;;  %s2993_s25 = smov %s2238_s26 }
 0x45d   : > { %s2995_s27 = smov %s2246_s28  ;;  %s2996_s28 = smov %s2250_s29 }
 0x45e   : > { %s2998_s30 = smov %s2262_s9  ;;  %s2999_s8 = smov %s2266_s10 }
 0x45f   :  { %30 = sbr.rel (!%p28_p9) target bundleno = 19 (0x13), region = 165 }
 0x460   : > { %s2994_s26 = smov %s2989_s23 }
 0x461   : > { %s2997_s29 = smov %s2990_s6  ;;  %s3000_s9 = smov %s2991_s17 }
 0x462   : > { %s3001_s10 = smov %s2992_s7 }
 0x466   :  { %1368 = vsyncpa [#allocation5], 1 }
 0x467   :  { %1370 = vsyncpa [#allocation5 + $0x1], 1 }
 0x468   :  { %1371 = vsyncpa [#allocation8], 1 }
 0x469   :  { %1373 = vsyncpa [#allocation8 + $0x1], 1 }
 0x46a   :  { %1374 = vsyncpa [#allocation11], 1 }
 0x46b   :  { %1375 = vsyncpa [#allocation6], 1 }
 0x46c   :  { %1377 = vsyncpa [#allocation6 + $0x1], 1 }
 0x46d   :  { %1378 = vsyncpa [#allocation15], 1 }
 0x46e   :  { %1380 = vsyncpa [#allocation15 + $0x1], 1 }

</bundles_post_ra>
